<compile_context>
chip_gen: v7x
topology: tpu7x:2x2x1
jax: 0.10.0
libtpu: 0.0.40
codegen_flags: <defaults>
</compile_context>

<pallas_src>
import functools

import numpy as np
import jax
import jax.numpy as jnp
from jax.experimental import pallas as pl
from jax.experimental.pallas import tpu as pltpu


_SENTINEL = 2 ** 30  # scatter index for masked / padded rows (never matches)


# -----------------------------------------------------------------------------
# Parameter construction (mirrors ACSF.__init__, deterministic, no checkpoints)
# -----------------------------------------------------------------------------
def build_acsf_params(atomic_numbers_list, cutoff=6.0):
    species = list(atomic_numbers_list)
    S = len(species)
    max_atom = max(species) + 1

    atom_to_index = np.full((max_atom,), max_atom + 1, dtype=np.int32)
    for i, a_str in enumerate(sorted(str(v) for v in species)):
        atom_to_index[int(a_str)] = i

    g2_etas = np.array([0.003214, 0.035711, 0.071421, 0.124987,
                        0.214264, 0.357106, 0.714213, 1.428426], dtype=np.float32)
    g4_etas = np.array([0.000357, 0.028569, 0.089277], dtype=np.float32)
    g4_zetas = np.array([1.0, 2.0, 4.0], dtype=np.float32)
    g4_lmdas = np.array([-1.0, 1.0], dtype=np.float32)

    n_eta, n_zeta, n_lmda = len(g4_etas), len(g4_zetas), len(g4_lmdas)

    # Full per-species tables (as in the torch module; identical values tiled).
    G2_params = np.tile(g2_etas, (S, S, 1)).astype(np.float32)
    G4_etas = np.tile(g4_etas, (S, S, S, 1)).astype(np.float32)
    G4_zetas = np.tile(g4_zetas, (S, S, S, 1)).astype(np.float32)
    G4_lmdas = np.tile(g4_lmdas, (S, S, S, 1)).astype(np.float32)

    # Flattened per-channel constants, channel order = row-major over
    # (n_eta, n_lmda, n_zeta), matching the torch reshape of res.
    eta_flat = np.repeat(g4_etas, n_lmda * n_zeta)
    lmda_flat = np.tile(np.repeat(g4_lmdas, n_zeta), n_eta)
    zeta_flat = np.tile(g4_zetas, n_eta * n_lmda)
    coef_flat = 2.0 ** (1.0 - zeta_flat)
    g4_const = np.stack([eta_flat, lmda_flat, zeta_flat, coef_flat],
                        axis=1).astype(np.float32)          # (18, 4)
    g2_const = g2_etas.reshape(-1, 1).astype(np.float32)    # (8, 1)
    # TODO(synk): if trainable=True or param files give species-dependent
    # tables, the per-triplet parameter gather path must be re-added.

    G2_list, G4_list = [], []
    for a1 in species:
        for i, a2 in enumerate(species):
            G2_list.append(str((a1, a2)))
            for j in range(i, S):
                a3 = species[j]
                G4_list.append(str((a1, a2, a3)))
    G4_list.sort()
    G2_list.sort()

    idx_mapping = np.zeros((max_atom, max_atom, max_atom), dtype=np.int32)
    count = np.zeros((max_atom,), dtype=np.int64)
    for s in G4_list:
        t = eval(s)
        idx_mapping[t[0], t[2], t[1]] = count[t[0]]
        idx_mapping[t[0], t[1], t[2]] = count[t[0]]
        count[t[0]] += 1

    idx_mapping_g2 = np.zeros((max_atom, max_atom), dtype=np.int32)
    count = np.zeros((max_atom,), dtype=np.int64)
    for s in G2_list:
        t = eval(s)
        idx_mapping_g2[t[0], t[1]] = count[t[0]]
        count[t[0]] += 1

    return dict(
        species=species, n_species=S, cutoff=float(cutoff),
        n_g2=int(len(g2_etas)), n_eta=int(n_eta),
        n_zeta=int(n_zeta), n_lmda=int(n_lmda),
        atom_to_index=jnp.asarray(atom_to_index),
        G2_params=jnp.asarray(G2_params),
        G4_etas=jnp.asarray(G4_etas),
        G4_zetas=jnp.asarray(G4_zetas),
        G4_lmdas=jnp.asarray(G4_lmdas),
        idx_mapping=jnp.asarray(idx_mapping),
        idx_mapping_g2=jnp.asarray(idx_mapping_g2),
        g4_const=jnp.asarray(g4_const),
        g2_const=jnp.asarray(g2_const),
    )


# -----------------------------------------------------------------------------
# Pallas kernels
# -----------------------------------------------------------------------------
def _g4_kernel(scal_ref, idx_ref, const_ref, out_ref, *, cutoff, m_tile):
    """Angular (G4) symmetry functions + one-hot scatter.

    scal_ref : (3, T_tile)  rows = [R_ba, R_ca, cos]        (T on lanes)
    idx_ref  : (T_tile, 1)  int32 scatter index (sentinel = drop)
    const_ref: (C, 4)       columns = [eta, lambda, zeta, 2^(1-zeta)]
    out_ref  : (C, M_tile)  f32 accumulator, resident across the T grid axis
    """
    t = pl.program_id(1)

    @pl.when(t == 0)
    def _init():
        out_ref[...] = jnp.zeros_like(out_ref)

    s = scal_ref[...]                       # (3, T)
    r_ba = s[0:1, :]
    r_ca = s[1:2, :]
    cosv = s[2:3, :]

    c = const_ref[...]                      # (C, 4)
    eta = c[:, 0:1]                         # (C, 1)
    lmda = c[:, 1:2]
    zeta = c[:, 2:3]
    coef = c[:, 3:4]

    # clamp: fp cancellation can make the squared distance slightly negative
    r_bc2 = jnp.maximum(r_ba * r_ba + r_ca * r_ca - 2.0 * r_ba * r_ca * cosv, 0.0)
    r_bc = jnp.sqrt(r_bc2)

    def fc(r):
        return 0.5 * jnp.cos(jnp.pi * r / cutoff) + 0.5

    cut = (fc(r_ca) * fc(r_bc) * fc(r_ba)
           * (r_bc < cutoff).astype(jnp.float32)
           * (r_ba < cutoff).astype(jnp.float32)
           * (r_ca < cutoff).astype(jnp.float32))           # (1, T)

    rsum2 = r_bc2 + r_ba * r_ba + r_ca * r_ca               # (1, T)
    rad = jnp.exp(-eta * rsum2)                             # (C, T)

    # |1 + lambda*cos|^zeta via integer powers (zeta in {1, 2, 4}).
    # TODO(synk): zeta values outside {1,2,4} would need a pow fallback.
    base = 1.0 + lmda * cosv                                # (C, T)
    p1 = jnp.abs(base)
    p2 = base * base
    p4 = p2 * p2
    powv = jnp.where(zeta == 1.0, p1, jnp.where(zeta == 2.0, p2, p4))

    res = (coef * powv) * rad * cut                         # (C, T)

    idx = idx_ref[...]                                      # (T, 1) int32
    T = idx.shape[0]
    cols = (jax.lax.broadcasted_iota(jnp.int32, (T, m_tile), 1)
            + pl.program_id(0) * m_tile)
    onehot = (cols == idx).astype(jnp.bfloat16)             # (T, M_tile)

    out_ref[...] += jnp.dot(res.astype(jnp.bfloat16), onehot,
                            preferred_element_type=jnp.float32)


def _g2_kernel(scal_ref, idx_ref, const_ref, out_ref, *, cutoff, m_tile):
    """Radial (G2) symmetry functions + one-hot scatter.

    scal_ref : (1, E_tile)  edge distances (E on lanes)
    idx_ref  : (E_tile, 1)  int32 scatter index
    const_ref: (C, 1)       G2 eta channel constants
    out_ref  : (C, M_tile)  f32 accumulator
    """
    t = pl.program_id(1)

    @pl.when(t == 0)
    def _init():
        out_ref[...] = jnp.zeros_like(out_ref)

    d = scal_ref[...][0:1, :]                               # (1, E)
    eta = const_ref[...][:, 0:1]                            # (C, 1)

    cut = 0.5 * jnp.cos(jnp.pi * d / cutoff) + 0.5          # (1, E)
    res = cut * jnp.exp(-eta * (d * d))                     # (C, E)

    idx = idx_ref[...]                                      # (E, 1)
    E = idx.shape[0]
    cols = (jax.lax.broadcasted_iota(jnp.int32, (E, m_tile), 1)
            + pl.program_id(0) * m_tile)
    onehot = (cols == idx).astype(jnp.bfloat16)             # (E, M_tile)

    out_ref[...] += jnp.dot(res.astype(jnp.bfloat16), onehot,
                            preferred_element_type=jnp.float32)


# -----------------------------------------------------------------------------
# pallas_call wrapper: tiled reduction over triplets/edges, parallel over M
# -----------------------------------------------------------------------------
def _round_up(x, m):
    return ((x + m - 1) // m) * m


def _scatter_call(kernel_body, scal, idx, const, n_ch, n_out,
                  *, max_t_tile=512, max_m_tile=256):
    rows, T = scal.shape
    t_tile = min(max_t_tile, _round_up(max(T, 1), 128))
    T_pad = _round_up(max(T, 1), t_tile)
    m_tile = min(max_m_tile, _round_up(n_out, 128))
    M_pad = _round_up(n_out, m_tile)

    scal_p = jnp.pad(scal.astype(jnp.float32), ((0, 0), (0, T_pad - T)))
    idx_p = jnp.pad(idx.astype(jnp.int32), (0, T_pad - T),
                    constant_values=_SENTINEL).reshape(T_pad, 1)

    grid = (M_pad // m_tile, T_pad // t_tile)

    flops = 2 * n_ch * T_pad * M_pad + 40 * n_ch * T_pad
    transcendentals = (n_ch + 6) * T_pad
    bytes_accessed = 4 * (rows * T_pad + T_pad + const.size + n_ch * M_pad)

    out = pl.pallas_call(
        functools.partial(kernel_body, m_tile=m_tile),
        grid=grid,
        in_specs=[
            pl.BlockSpec((rows, t_tile), lambda m, t: (0, t)),   # scalars
            pl.BlockSpec((t_tile, 1), lambda m, t: (t, 0)),      # scatter idx
            pl.BlockSpec(const.shape, lambda m, t: (0, 0)),      # channel consts
        ],
        out_specs=pl.BlockSpec((n_ch, m_tile), lambda m, t: (0, m)),
        out_shape=jax.ShapeDtypeStruct((n_ch, M_pad), jnp.float32),
        compiler_params=pltpu.CompilerParams(
            dimension_semantics=("parallel", "arbitrary"),
            vmem_limit_bytes=32 * 1024 * 1024),
        cost_estimate=pl.CostEstimate(
            flops=int(flops),
            transcendentals=int(transcendentals),
            bytes_accessed=int(bytes_accessed)),
    )(scal_p, idx_p, const)
    # TODO(synk): for very large P*N, add block-skipping (sorted indices +
    # scalar prefetch) so empty (M_tile, T_tile) one-hot blocks are skipped.
    return out[:, :n_out]


# -----------------------------------------------------------------------------
# Forward pass (JAX glue: gathers, index construction, final reshapes)
# -----------------------------------------------------------------------------
def acsf_forward_pallas(params, atomic_numbers, edge_index, D_st,
                        id3_ba, id3_ca, cos_cab):
    N = atomic_numbers.shape[0]
    S = params["n_species"]
    P = S * (S + 1) // 2
    rc = params["cutoff"]
    n_eta, n_lmda, n_zeta = params["n_eta"], params["n_lmda"], params["n_zeta"]
    n_g2 = params["n_g2"]
    nc = n_eta * n_lmda * n_zeta
    M4, M2 = P * N, S * N

    # --- G4 (angular) ---
    mask = id3_ba > id3_ca
    D_ba = D_st[id3_ba].astype(jnp.float32)
    D_ca = D_st[id3_ca].astype(jnp.float32)
    atomb = atomic_numbers[edge_index[0, id3_ba]]
    atomc = atomic_numbers[edge_index[0, id3_ca]]
    atoma = atomic_numbers[edge_index[1, id3_ca]]
    desc = params["idx_mapping"][atoma, atomb, atomc]
    idx4 = jnp.where(mask, edge_index[1, id3_ca] + desc * N, _SENTINEL)
    scal4 = jnp.stack([D_ba, D_ca, cos_cab.astype(jnp.float32)], axis=0)  # (3,T)

    out4 = _scatter_call(functools.partial(_g4_kernel, cutoff=rc),
                         scal4, idx4, params["g4_const"], nc, M4)

    # --- G2 (radial) ---
    at = atomic_numbers[edge_index[1]]
    asrc = atomic_numbers[edge_index[0]]
    desc2 = params["idx_mapping_g2"][at, asrc]
    idx2 = edge_index[1] + desc2 * N
    scal2 = D_st.astype(jnp.float32).reshape(1, -1)                        # (1,E)

    out2 = _scatter_call(functools.partial(_g2_kernel, cutoff=rc),
                         scal2, idx2, params["g2_const"], n_g2, M2)

    # out4[c, p*N + n] / out2[g, s*N + n]  ->  (N, ..., P) / (N, n_g2, S)
    res_g4 = out4.reshape(n_eta, n_lmda, n_zeta, P, N).transpose(4, 0, 1, 2, 3)
    res_g2 = out2.reshape(n_g2, S, N).transpose(2, 0, 1)
    return jnp.concatenate([res_g2.reshape(N, -1), res_g4.reshape(N, -1)],
                           axis=-1)


def acsf_forward_reference(params, atomic_numbers, edge_index, D_st,
                           id3_ba, id3_ca, cos_cab):
    """Pure-JAX reference (per-triplet parameter gathers + .at[].add scatter)."""
    N = atomic_numbers.shape[0]
    S = params["n_species"]
    P = S * (S + 1) // 2
    rc = params["cutoff"]
    n_eta, n_lmda, n_zeta = params["n_eta"], params["n_lmda"], params["n_zeta"]
    n_g2 = params["n_g2"]
    nc = n_eta * n_lmda * n_zeta
    a2i = params["atom_to_index"]

    mask = id3_ba > id3_ca
    D_ba = D_st[id3_ba].astype(jnp.float32)
    D_ca = D_st[id3_ca].astype(jnp.float32)
    cosv = cos_cab.astype(jnp.float32)
    atomb = atomic_numbers[edge_index[0, id3_ba]]
    atomc = atomic_numbers[edge_index[0, id3_ca]]
    atoma = atomic_numbers[edge_index[1, id3_ca]]
    ia, ib, ic = a2i[atoma], a2i[atomb], a2i[atomc]
    etas = params["G4_etas"][ia, ib, ic]          # (T, n_eta)
    zetas = params["G4_zetas"][ia, ib, ic]        # (T, n_zeta)
    lmdas = params["G4_lmdas"][ia, ib, ic]        # (T, n_lmda)

    R_bc = jnp.sqrt(jnp.maximum(D_ba * D_ba + D_ca * D_ca
                                - 2.0 * D_ba * D_ca * cosv, 0.0))
    fc = lambda r: 0.5 * jnp.cos(jnp.pi * r / rc) + 0.5
    cut = (fc(D_ca) * fc(R_bc) * fc(D_ba)
           * (R_bc < rc) * (D_ba < rc) * (D_ca < rc)).astype(jnp.float32)
    rad = jnp.exp(-etas * (R_bc * R_bc + D_ba * D_ba + D_ca * D_ca)[:, None])
    cos_lmda = jnp.power(jnp.abs(1.0 + lmdas[:, :, None] * cosv[:, None, None]),
                         zetas[:, None, :])                       # (T,l,z)
    res4 = cos_lmda[:, None, :, :] * rad[:, :, None, None] * cut[:, None, None, None]
    res4 = jnp.power(2.0, 1.0 - zetas[:, None, :])[:, None, :, :] * res4
    res4 = res4.reshape(res4.shape[0], -1)                        # (T, nc)
    res4 = jnp.where(mask[:, None], res4, 0.0)
    desc = params["idx_mapping"][atoma, atomb, atomc]
    idx4 = jnp.where(mask, edge_index[1, id3_ca] + desc * N, 0)
    res_g4 = jnp.zeros((P * N, nc), jnp.float32).at[idx4].add(res4)

    at = atomic_numbers[edge_index[1]]
    asrc = atomic_numbers[edge_index[0]]
    eta2 = params["G2_params"][a2i[at], a2i[asrc]]
    D = D_st.astype(jnp.float32)
    cut2 = 0.5 * jnp.cos(jnp.pi * D / rc) + 0.5
    res2 = cut2[:, None] * jnp.exp(-eta2 * (D * D)[:, None])
    desc2 = params["idx_mapping_g2"][at, asrc]
    idx2 = edge_index[1] + desc2 * N
    res_g2 = jnp.zeros((S * N, n_g2), jnp.float32).at[idx2].add(res2)

    res_g4 = res_g4.reshape(P, N, n_eta, n_lmda, n_zeta).transpose(1, 2, 3, 4, 0)
    res_g2 = res_g2.reshape(S, N, n_g2).transpose(1, 2, 0)
    return jnp.concatenate([res_g2.reshape(N, -1), res_g4.reshape(N, -1)],
                           axis=-1)


# -----------------------------------------------------------------------------
# Demo / test
# -----------------------------------------------------------------------------
if __name__ == "__main__":
    species = [1, 8]                     # H, O
    params = build_acsf_params(species, cutoff=6.0)

    key = jax.random.PRNGKey(0)
    kz, kp = jax.random.split(key)
    N = 8
    z = np.array(jax.random.choice(kz, jnp.array(species, dtype=jnp.int32),
                                   (N,)), dtype=np.int32)
    z[0], z[1] = 1, 8                    # ensure both species present
    pos = np.array(jax.random.uniform(kp, (N, 3), minval=0.0, maxval=4.0,
                                      dtype=jnp.float32), dtype=np.float64)

    # all ordered pairs as edges: edge_index[0] = neighbor (src), [1] = center
    src, tgt = [], []
    for a in range(N):
        for b in range(N):
            if a != b:
                src.append(b)
                tgt.append(a)
    edge_index = np.array([src, tgt], dtype=np.int32)           # (2, E)
    E = edge_index.shape[1]
    D_st = np.linalg.norm(pos[edge_index[0]] - pos[edge_index[1]],
                          axis=-1).astype(np.float32)           # (E,)

    # angular triplets: ordered pairs of distinct edges sharing the center
    edges_of = [[] for _ in range(N)]
    for e in range(E):
        edges_of[edge_index[1, e]].append(e)
    id3_ba, id3_ca, cosv = [], [], []
    for a in range(N):
        for e1 in edges_of[a]:
            for e2 in edges_of[a]:
                if e1 == e2:
                    continue
                b = edge_index[0, e1]
                c = edge_index[0, e2]
                v1 = pos[b] - pos[a]
                v2 = pos[c] - pos[a]
                cv = float(np.dot(v1, v2) /
                           (np.linalg.norm(v1) * np.linalg.norm(v2)))
                id3_ba.append(e1)
                id3_ca.append(e2)
                cosv.append(cv)
    id3_ba = np.array(id3_ba, dtype=np.int32)
    id3_ca = np.array(id3_ca, dtype=np.int32)
    cos_cab = np.array(cosv, dtype=np.float32)

    args = (jnp.asarray(z), jnp.asarray(edge_index), jnp.asarray(D_st),
            jnp.asarray(id3_ba), jnp.asarray(id3_ca), jnp.asarray(cos_cab))

    fwd = jax.jit(lambda *a: acsf_forward_pallas(params, *a))
    desc = jax.block_until_ready(fwd(*args))

    ref = jax.block_until_ready(acsf_forward_reference(params, *args))
    # bf16 MXU operands give ~0.2-0.4% relative error; accumulation stays f32.
    np.testing.assert_allclose(np.asarray(desc), np.asarray(ref),
                               rtol=1e-2, atol=1e-4)

    # expected descriptor dim: S*n_g2 + P*n_eta*n_lmda*n_zeta
    S = params["n_species"]
    P = S * (S + 1) // 2
    expected_dim = (S * params["n_g2"]
                    + P * params["n_eta"] * params["n_lmda"] * params["n_zeta"])
    assert desc.shape == (N, expected_dim), desc.shape

    # per-species dict (data-dependent row selection done host-side)
    desc_np = np.asarray(desc)
    result = {}
    for atom in params["species"]:
        m = (z == atom)
        if m.sum() > 0:
            result[atom] = desc_np[m]

    print("KERNEL_OK")
</pallas_src>

<mosaic_0001>
module attributes {stable_mosaic.version = 11 : i64} {
  func.func @_g4_kernel(%arg0: i32, %arg1: i32, %arg2: memref<3x384xf32, #tpu.memory_space<vmem>>, %arg3: memref<384x1xi32, #tpu.memory_space<vmem>>, %arg4: memref<18x4xf32, #tpu.memory_space<vmem>>, %arg5: memref<18x128xf32, #tpu.memory_space<vmem>>) attributes {dimension_semantics = [#tpu.dimension_semantics<parallel>, #tpu.dimension_semantics<arbitrary>], iteration_bounds = array<i64: 1, 1>, scalar_prefetch = 0 : i64, scratch_operands = 0 : i64, tpu.core_type = #tpu.core_type<tc>, window_params = [{transform_indices = @transform_0, window_bounds = array<i64: 3, 384>}, {transform_indices = @transform_1, window_bounds = array<i64: 384, 1>}, {pipeline_mode = #tpu.pipeline_mode<synchronous>, transform_indices = @transform_2, window_bounds = array<i64: 18, 4>}, {transform_indices = @transform_3, window_bounds = array<i64: 18, 128>}]} {
    %c0_i32 = arith.constant 0 : i32
    %0 = arith.cmpi eq, %arg1, %c0_i32 : i32
    %1 = arith.extui %0 : i1 to i32
    %c0_i32_0 = arith.constant 0 : i32
    %2 = arith.cmpi ne, %1, %c0_i32_0 : i32
    scf.if %2 {
      %cst_31 = arith.constant 0.000000e+00 : f32
      %115 = vector.broadcast %cst_31 : f32 to vector<18x128xf32>
      %c0_32 = arith.constant 0 : index
      %c0_33 = arith.constant 0 : index
      %116 = vector.load %arg5[%c0_32, %c0_33] : memref<18x128xf32, #tpu.memory_space<vmem>>, vector<18x128xf32>
      tpu.vector_store %arg5[%c0_32, %c0_33], %115 {strides = array<i32>} : memref<18x128xf32, #tpu.memory_space<vmem>>, vector<18x128xf32>,
    } else {
    }
    %c0 = arith.constant 0 : index
    %c0_1 = arith.constant 0 : index
    %3 = vector.load %arg2[%c0, %c0_1] : memref<3x384xf32, #tpu.memory_space<vmem>>, vector<3x384xf32>
    %4 = vector.extract_strided_slice %3 {offsets = [0, 0], sizes = [1, 384], strides = [1, 1]} : vector<3x384xf32> to vector<1x384xf32>
    %5 = vector.extract_strided_slice %3 {offsets = [1, 0], sizes = [1, 384], strides = [1, 1]} : vector<3x384xf32> to vector<1x384xf32>
    %6 = vector.extract_strided_slice %3 {offsets = [2, 0], sizes = [1, 384], strides = [1, 1]} : vector<3x384xf32> to vector<1x384xf32>
    %c0_2 = arith.constant 0 : index
    %c0_3 = arith.constant 0 : index
    %7 = vector.load %arg4[%c0_2, %c0_3] : memref<18x4xf32, #tpu.memory_space<vmem>>, vector<18x4xf32>
    %8 = vector.extract_strided_slice %7 {offsets = [0, 0], sizes = [18, 1], strides = [1, 1]} : vector<18x4xf32> to vector<18x1xf32>
    %9 = vector.extract_strided_slice %7 {offsets = [0, 1], sizes = [18, 1], strides = [1, 1]} : vector<18x4xf32> to vector<18x1xf32>
    %10 = vector.extract_strided_slice %7 {offsets = [0, 2], sizes = [18, 1], strides = [1, 1]} : vector<18x4xf32> to vector<18x1xf32>
    %11 = vector.extract_strided_slice %7 {offsets = [0, 3], sizes = [18, 1], strides = [1, 1]} : vector<18x4xf32> to vector<18x1xf32>
    %12 = arith.mulf %4, %4 : vector<1x384xf32>
    %13 = arith.mulf %5, %5 : vector<1x384xf32>
    %14 = arith.addf %12, %13 : vector<1x384xf32>
    %cst = arith.constant 2.000000e+00 : f32
    %15 = vector.broadcast %cst : f32 to vector<1x384xf32>
    %16 = arith.mulf %15, %4 : vector<1x384xf32>
    %17 = arith.mulf %16, %5 : vector<1x384xf32>
    %18 = arith.mulf %17, %6 : vector<1x384xf32>
    %19 = arith.subf %14, %18 : vector<1x384xf32>
    %cst_4 = arith.constant 0.000000e+00 : f32
    %20 = vector.broadcast %cst_4 : f32 to vector<1x384xf32>
    %21 = arith.maximumf %19, %20 : vector<1x384xf32>
    %22 = math.sqrt %21 : vector<1x384xf32>
    %cst_5 = arith.constant 3.14159274 : f32
    %23 = vector.broadcast %cst_5 : f32 to vector<1x384xf32>
    %24 = arith.mulf %23, %5 : vector<1x384xf32>
    %cst_6 = arith.constant 6.000000e+00 : f32
    %25 = vector.broadcast %cst_6 : f32 to vector<1x384xf32>
    %26 = arith.divf %24, %25 : vector<1x384xf32>
    %27 = math.cos %26 : vector<1x384xf32>
    %cst_7 = arith.constant 5.000000e-01 : f32
    %28 = vector.broadcast %cst_7 : f32 to vector<1x384xf32>
    %29 = arith.mulf %28, %27 : vector<1x384xf32>
    %cst_8 = arith.constant 5.000000e-01 : f32
    %30 = vector.broadcast %cst_8 : f32 to vector<1x384xf32>
    %31 = arith.addf %29, %30 : vector<1x384xf32>
    %cst_9 = arith.constant 3.14159274 : f32
    %32 = vector.broadcast %cst_9 : f32 to vector<1x384xf32>
    %33 = arith.mulf %32, %22 : vector<1x384xf32>
    %cst_10 = arith.constant 6.000000e+00 : f32
    %34 = vector.broadcast %cst_10 : f32 to vector<1x384xf32>
    %35 = arith.divf %33, %34 : vector<1x384xf32>
    %36 = math.cos %35 : vector<1x384xf32>
    %cst_11 = arith.constant 5.000000e-01 : f32
    %37 = vector.broadcast %cst_11 : f32 to vector<1x384xf32>
    %38 = arith.mulf %37, %36 : vector<1x384xf32>
    %cst_12 = arith.constant 5.000000e-01 : f32
    %39 = vector.broadcast %cst_12 : f32 to vector<1x384xf32>
    %40 = arith.addf %38, %39 : vector<1x384xf32>
    %41 = arith.mulf %31, %40 : vector<1x384xf32>
    %cst_13 = arith.constant 3.14159274 : f32
    %42 = vector.broadcast %cst_13 : f32 to vector<1x384xf32>
    %43 = arith.mulf %42, %4 : vector<1x384xf32>
    %cst_14 = arith.constant 6.000000e+00 : f32
    %44 = vector.broadcast %cst_14 : f32 to vector<1x384xf32>
    %45 = arith.divf %43, %44 : vector<1x384xf32>
    %46 = math.cos %45 : vector<1x384xf32>
    %cst_15 = arith.constant 5.000000e-01 : f32
    %47 = vector.broadcast %cst_15 : f32 to vector<1x384xf32>
    %48 = arith.mulf %47, %46 : vector<1x384xf32>
    %cst_16 = arith.constant 5.000000e-01 : f32
    %49 = vector.broadcast %cst_16 : f32 to vector<1x384xf32>
    %50 = arith.addf %48, %49 : vector<1x384xf32>
    %51 = arith.mulf %41, %50 : vector<1x384xf32>
    %cst_17 = arith.constant 6.000000e+00 : f32
    %52 = vector.broadcast %cst_17 : f32 to vector<1x384xf32>
    %53 = arith.cmpf olt, %22, %52 : vector<1x384xf32>
    %54 = arith.extui %53 : vector<1x384xi1> to vector<1x384xi32>
    %55 = arith.sitofp %54 : vector<1x384xi32> to vector<1x384xf32>
    %56 = arith.mulf %51, %55 : vector<1x384xf32>
    %cst_18 = arith.constant 6.000000e+00 : f32
    %57 = vector.broadcast %cst_18 : f32 to vector<1x384xf32>
    %58 = arith.cmpf olt, %4, %57 : vector<1x384xf32>
    %59 = arith.extui %58 : vector<1x384xi1> to vector<1x384xi32>
    %60 = arith.sitofp %59 : vector<1x384xi32> to vector<1x384xf32>
    %61 = arith.mulf %56, %60 : vector<1x384xf32>
    %cst_19 = arith.constant 6.000000e+00 : f32
    %62 = vector.broadcast %cst_19 : f32 to vector<1x384xf32>
    %63 = arith.cmpf olt, %5, %62 : vector<1x384xf32>
    %64 = arith.extui %63 : vector<1x384xi1> to vector<1x384xi32>
    %65 = arith.sitofp %64 : vector<1x384xi32> to vector<1x384xf32>
    %66 = arith.mulf %61, %65 : vector<1x384xf32>
    %67 = arith.mulf %4, %4 : vector<1x384xf32>
    %68 = arith.addf %21, %67 : vector<1x384xf32>
    %69 = arith.mulf %5, %5 : vector<1x384xf32>
    %70 = arith.addf %68, %69 : vector<1x384xf32>
    %cst_20 = arith.constant 0.000000e+00 : f32
    %71 = vector.broadcast %cst_20 : f32 to vector<18x1xf32>
    %72 = arith.subf %71, %8 : vector<18x1xf32>
    %73 = vector.broadcast %72 : vector<18x1xf32> to vector<18x384xf32>
    %74 = vector.broadcast %70 : vector<1x384xf32> to vector<18x384xf32>
    %75 = arith.mulf %73, %74 : vector<18x384xf32>
    %76 = math.exp %75 : vector<18x384xf32>
    %77 = vector.broadcast %9 : vector<18x1xf32> to vector<18x384xf32>
    %78 = vector.broadcast %6 : vector<1x384xf32> to vector<18x384xf32>
    %79 = arith.mulf %77, %78 : vector<18x384xf32>
    %cst_21 = arith.constant 1.000000e+00 : f32
    %80 = vector.broadcast %cst_21 : f32 to vector<18x384xf32>
    %81 = arith.addf %80, %79 : vector<18x384xf32>
    %82 = math.absf %81 : vector<18x384xf32>
    %83 = arith.mulf %81, %81 : vector<18x384xf32>
    %84 = arith.mulf %83, %83 : vector<18x384xf32>
    %cst_22 = arith.constant 1.000000e+00 : f32
    %85 = vector.broadcast %cst_22 : f32 to vector<18x1xf32>
    %86 = arith.cmpf oeq, %10, %85 : vector<18x1xf32>
    %cst_23 = arith.constant 2.000000e+00 : f32
    %87 = vector.broadcast %cst_23 : f32 to vector<18x1xf32>
    %88 = arith.cmpf oeq, %10, %87 : vector<18x1xf32>
    %89 = vector.shape_cast %88 : vector<18x1xi1> to vector<18x1xi1>
    %90 = vector.broadcast %89 : vector<18x1xi1> to vector<18x384xi1>
    %91 = arith.select %90, %83, %84 : vector<18x384xi1>, vector<18x384xf32>
    %92 = vector.shape_cast %86 : vector<18x1xi1> to vector<18x1xi1>
    %93 = vector.broadcast %92 : vector<18x1xi1> to vector<18x384xi1>
    %94 = arith.select %93, %82, %91 : vector<18x384xi1>, vector<18x384xf32>
    %95 = vector.broadcast %11 : vector<18x1xf32> to vector<18x384xf32>
    %96 = arith.mulf %95, %94 : vector<18x384xf32>
    %97 = arith.mulf %96, %76 : vector<18x384xf32>
    %98 = vector.broadcast %66 : vector<1x384xf32> to vector<18x384xf32>
    %99 = arith.mulf %97, %98 : vector<18x384xf32>
    %c0_24 = arith.constant 0 : index
    %c0_25 = arith.constant 0 : index
    %100 = vector.load %arg3[%c0_24, %c0_25] : memref<384x1xi32, #tpu.memory_space<vmem>>, vector<384x1xi32>
    %101 = tpu.iota {dimensions = array<i32: 1>} : vector<384x128xi32>
    %c128_i32 = arith.constant 128 : i32
    %102 = arith.muli %arg0, %c128_i32 : i32
    %103 = vector.broadcast %102 : i32 to vector<384x128xi32>
    %104 = arith.addi %101, %103 : vector<384x128xi32>
    %105 = vector.broadcast %100 : vector<384x1xi32> to vector<384x128xi32>
    %106 = arith.cmpi eq, %104, %105 : vector<384x128xi32>
    %107 = arith.extui %106 : vector<384x128xi1> to vector<384x128xi32>
    %108 = arith.sitofp %107 : vector<384x128xi32> to vector<384x128xf32>
    %109 = arith.truncf %108 : vector<384x128xf32> to vector<384x128xbf16>
    %c0_26 = arith.constant 0 : index
    %c0_27 = arith.constant 0 : index
    %110 = vector.load %arg5[%c0_26, %c0_27] : memref<18x128xf32, #tpu.memory_space<vmem>>, vector<18x128xf32>
    %111 = arith.truncf %99 : vector<18x384xf32> to vector<18x384xbf16>
    %cst_28 = arith.constant dense<0.000000e+00> : vector<18x128xf32>
    %112 = tpu.matmul %111, %109, %cst_28 {dimension_numbers = #tpu.dot_dimension_numbers<[1], [0], [0], [1], [0, 0, 1, 1], [], []>} : vector<18x384xbf16>, vector<384x128xbf16>, vector<18x128xf32> -> vector<18x128xf32>
    %113 = arith.addf %110, %112 : vector<18x128xf32>
    %c0_29 = arith.constant 0 : index
    %c0_30 = arith.constant 0 : index
    %114 = vector.load %arg5[%c0_29, %c0_30] : memref<18x128xf32, #tpu.memory_space<vmem>>, vector<18x128xf32>
    tpu.vector_store %arg5[%c0_29, %c0_30], %113 {strides = array<i32>} : memref<18x128xf32, #tpu.memory_space<vmem>>, vector<18x128xf32>,
    return
  }
  func.func @transform_0(%arg0: i32, %arg1: i32) -> (i32, i32) {
    %c0_i32 = arith.constant 0 : i32
    %c0_i32_0 = arith.constant 0 : i32
    return %c0_i32, %arg1 : i32, i32
  }
  func.func @transform_1(%arg0: i32, %arg1: i32) -> (i32, i32) {
    %c0_i32 = arith.constant 0 : i32
    %c0_i32_0 = arith.constant 0 : i32
    return %arg1, %c0_i32 : i32, i32
  }
  func.func @transform_2(%arg0: i32, %arg1: i32) -> (i32, i32) {
    %c0_i32 = arith.constant 0 : i32
    %c0_i32_0 = arith.constant 0 : i32
    %c0_i32_1 = arith.constant 0 : i32
    return %c0_i32, %c0_i32_0 : i32, i32
  }
  func.func @transform_3(%arg0: i32, %arg1: i32) -> (i32, i32) {
    %c0_i32 = arith.constant 0 : i32
    %c0_i32_0 = arith.constant 0 : i32
    return %c0_i32, %arg0 : i32, i32
  }
}

module attributes {stable_mosaic.version = 11 : i64} {
  func.func @_g2_kernel(%arg0: i32, %arg1: i32, %arg2: memref<1x128xf32, #tpu.memory_space<vmem>>, %arg3: memref<128x1xi32, #tpu.memory_space<vmem>>, %arg4: memref<8x1xf32, #tpu.memory_space<vmem>>, %arg5: memref<8x128xf32, #tpu.memory_space<vmem>>) attributes {dimension_semantics = [#tpu.dimension_semantics<parallel>, #tpu.dimension_semantics<arbitrary>], iteration_bounds = array<i64: 1, 1>, scalar_prefetch = 0 : i64, scratch_operands = 0 : i64, tpu.core_type = #tpu.core_type<tc>, window_params = [{transform_indices = @transform_0, window_bounds = array<i64: 1, 128>}, {transform_indices = @transform_1, window_bounds = array<i64: 128, 1>}, {pipeline_mode = #tpu.pipeline_mode<synchronous>, transform_indices = @transform_2, window_bounds = array<i64: 8, 1>}, {transform_indices = @transform_3, window_bounds = array<i64: 8, 128>}]} {
    %c0_i32 = arith.constant 0 : i32
    %0 = arith.cmpi eq, %arg1, %c0_i32 : i32
    %1 = arith.extui %0 : i1 to i32
    %c0_i32_0 = arith.constant 0 : i32
    %2 = arith.cmpi ne, %1, %c0_i32_0 : i32
    scf.if %2 {
      %cst_15 = arith.constant 0.000000e+00 : f32
      %38 = vector.broadcast %cst_15 : f32 to vector<8x128xf32>
      %c0_16 = arith.constant 0 : index
      %c0_17 = arith.constant 0 : index
      %39 = vector.load %arg5[%c0_16, %c0_17] : memref<8x128xf32, #tpu.memory_space<vmem>>, vector<8x128xf32>
      tpu.vector_store %arg5[%c0_16, %c0_17], %38 {strides = array<i32>} : memref<8x128xf32, #tpu.memory_space<vmem>>, vector<8x128xf32>,
    } else {
    }
    %c0 = arith.constant 0 : index
    %c0_1 = arith.constant 0 : index
    %3 = vector.load %arg2[%c0, %c0_1] : memref<1x128xf32, #tpu.memory_space<vmem>>, vector<1x128xf32>
    %c0_2 = arith.constant 0 : index
    %c0_3 = arith.constant 0 : index
    %4 = vector.load %arg4[%c0_2, %c0_3] : memref<8x1xf32, #tpu.memory_space<vmem>>, vector<8x1xf32>
    %cst = arith.constant 3.14159274 : f32
    %5 = vector.broadcast %cst : f32 to vector<1x128xf32>
    %6 = arith.mulf %5, %3 : vector<1x128xf32>
    %cst_4 = arith.constant 6.000000e+00 : f32
    %7 = vector.broadcast %cst_4 : f32 to vector<1x128xf32>
    %8 = arith.divf %6, %7 : vector<1x128xf32>
    %9 = math.cos %8 : vector<1x128xf32>
    %cst_5 = arith.constant 5.000000e-01 : f32
    %10 = vector.broadcast %cst_5 : f32 to vector<1x128xf32>
    %11 = arith.mulf %10, %9 : vector<1x128xf32>
    %cst_6 = arith.constant 5.000000e-01 : f32
    %12 = vector.broadcast %cst_6 : f32 to vector<1x128xf32>
    %13 = arith.addf %11, %12 : vector<1x128xf32>
    %cst_7 = arith.constant 0.000000e+00 : f32
    %14 = vector.broadcast %cst_7 : f32 to vector<8x1xf32>
    %15 = arith.subf %14, %4 : vector<8x1xf32>
    %16 = arith.mulf %3, %3 : vector<1x128xf32>
    %17 = vector.broadcast %15 : vector<8x1xf32> to vector<8x128xf32>
    %18 = vector.broadcast %16 : vector<1x128xf32> to vector<8x128xf32>
    %19 = arith.mulf %17, %18 : vector<8x128xf32>
    %20 = math.exp %19 : vector<8x128xf32>
    %21 = vector.broadcast %13 : vector<1x128xf32> to vector<8x128xf32>
    %22 = arith.mulf %21, %20 : vector<8x128xf32>
    %c0_8 = arith.constant 0 : index
    %c0_9 = arith.constant 0 : index
    %23 = vector.load %arg3[%c0_8, %c0_9] : memref<128x1xi32, #tpu.memory_space<vmem>>, vector<128x1xi32>
    %24 = tpu.iota {dimensions = array<i32: 1>} : vector<128x128xi32>
    %c128_i32 = arith.constant 128 : i32
    %25 = arith.muli %arg0, %c128_i32 : i32
    %26 = vector.broadcast %25 : i32 to vector<128x128xi32>
    %27 = arith.addi %24, %26 : vector<128x128xi32>
    %28 = vector.broadcast %23 : vector<128x1xi32> to vector<128x128xi32>
    %29 = arith.cmpi eq, %27, %28 : vector<128x128xi32>
    %30 = arith.extui %29 : vector<128x128xi1> to vector<128x128xi32>
    %31 = arith.sitofp %30 : vector<128x128xi32> to vector<128x128xf32>
    %32 = arith.truncf %31 : vector<128x128xf32> to vector<128x128xbf16>
    %c0_10 = arith.constant 0 : index
    %c0_11 = arith.constant 0 : index
    %33 = vector.load %arg5[%c0_10, %c0_11] : memref<8x128xf32, #tpu.memory_space<vmem>>, vector<8x128xf32>
    %34 = arith.truncf %22 : vector<8x128xf32> to vector<8x128xbf16>
    %cst_12 = arith.constant dense<0.000000e+00> : vector<8x128xf32>
    %35 = tpu.matmul %34, %32, %cst_12 {dimension_numbers = #tpu.dot_dimension_numbers<[1], [0], [0], [1], [0, 0, 1, 1], [], []>} : vector<8x128xbf16>, vector<128x128xbf16>, vector<8x128xf32> -> vector<8x128xf32>
    %36 = arith.addf %33, %35 : vector<8x128xf32>
    %c0_13 = arith.constant 0 : index
    %c0_14 = arith.constant 0 : index
    %37 = vector.load %arg5[%c0_13, %c0_14] : memref<8x128xf32, #tpu.memory_space<vmem>>, vector<8x128xf32>
    tpu.vector_store %arg5[%c0_13, %c0_14], %36 {strides = array<i32>} : memref<8x128xf32, #tpu.memory_space<vmem>>, vector<8x128xf32>,
    return
  }
  func.func @transform_0(%arg0: i32, %arg1: i32) -> (i32, i32) {
    %c0_i32 = arith.constant 0 : i32
    %c0_i32_0 = arith.constant 0 : i32
    return %c0_i32, %arg1 : i32, i32
  }
  func.func @transform_1(%arg0: i32, %arg1: i32) -> (i32, i32) {
    %c0_i32 = arith.constant 0 : i32
    %c0_i32_0 = arith.constant 0 : i32
    return %arg1, %c0_i32 : i32, i32
  }
  func.func @transform_2(%arg0: i32, %arg1: i32) -> (i32, i32) {
    %c0_i32 = arith.constant 0 : i32
    %c0_i32_0 = arith.constant 0 : i32
    %c0_i32_1 = arith.constant 0 : i32
    return %c0_i32, %c0_i32_0 : i32, i32
  }
  func.func @transform_3(%arg0: i32, %arg1: i32) -> (i32, i32) {
    %c0_i32 = arith.constant 0 : i32
    %c0_i32_0 = arith.constant 0 : i32
    return %c0_i32, %arg0 : i32, i32
  }
}

</mosaic_0001>

<bundles_post_ra>
// kernel: _lambda_.3
= control target key start
LH: loop header
LB: loop body
LE: loop exit
PB: predicated region body
PF: predicated region fallthrough
CT: control target
= control target key end

     0   :  { %v413_v0 = vmov 0   ;;  %v414_v9 = vmov 0.0   ;;  %v415_v30 = vmov 683565275   ;;  %v416_v32 = vmov 2475754826   ;;  %s573_s1 = inlined_call_operand.vmem [shape: s32[128,1], index: 1, kind: input, shape index: {}]   ;;  %s574_s0 = inlined_call_operand.vmem [shape: f32[1,128], index: 0, kind: input, shape index: {}]   ;;  %s575_s2 = inlined_call_operand.vmem [shape: f32[8,1], index: 2, kind: input, shape index: {}]   ;;  %s576_s3 = inlined_call_operand.vmem [shape: f32[8,128], index: 3, kind: output, shape index: {}]  }
   0x1   :  { %406 = vset.pattern.permute.xlu1 %v413_v0  ;;  %405 = vset.pattern.permute.xlu0 %v413_v0  ;;  %v155_v1 = vld [vmem:[%s573_s1 + $0x10] sm:$0xff]  ;;  %v153_v2 = vld [vmem:[%s573_s1] sm:$0xff]  ;;  %v156_v3 = vld [vmem:[%s573_s1 + $0x18] sm:$0xff]  ;;  %v417_v34 = vmov 2131351028   ;;  %vm421_vm5 = vmmov 0  }
   0x2   :  { %181 = vperm.xlu1 %406, %v155_v1   ;;  %175 = vperm.xlu0 %405, %v153_v2   ;;  %v154_v4 = vld [vmem:[%s573_s1 + $0x8] sm:$0xff]  ;;  %v458_v5 = vld [vmem:[%s574_s0] sm:$0x1]  ;;  %v160_v11 = vld [vmem:[%s573_s1 + $0x38] sm:$0xff]  ;;  %v418_v36 = vmov 2102212464  }
   0x3   :  { %v158_v6 = vld [vmem:[%s573_s1 + $0x28] sm:$0xff]  ;;  %v157_v7 = vld [vmem:[%s573_s1 + $0x20] sm:$0xff]  ;;  %v22_v8 = vmul.f32 3.1415927, %v458_v5  ;;  %371 = vmatprep.subr.bf16.mxu0 %v414_v9  ;;  %v159_v12 = vld [vmem:[%s573_s1 + $0x30] sm:$0xff]  ;;  %387 = vmatprep.mubr.msk.bf16.mxu0 %vm421_vm5, %v414_v9 }
   0x4   :  { %v21_v13 = vld [vmem:[%s575_s2] sm:$0xff]  ;;  %v163_v21 = vld [vmem:[%s573_s1 + $0x50] sm:$0xff]  ;;  %v162_v22 = vld [vmem:[%s573_s1 + $0x48] sm:$0xff]  ;;  %v419_v38 = vmov 920167782  }
   0x5   :  { %v468_v10 = vmul.f32 0.16666667, %v22_v8  ;;  %v130_v16 = vsub.f32 0.0, %v21_v13  ;;  %v161_v17 = vld [vmem:[%s573_s1 + $0x40] sm:$0xff]  ;;  %v164_v28 = vld [vmem:[%s573_s1 + $0x58] sm:$0xff]  ;;  %v167_v47 = vld [vmem:[%s573_s1 + $0x70] sm:$0xff] }
   0x6   :  { %184 = vperm.xlu1 %406, %v156_v3   ;;  %178 = vperm.xlu0 %405, %v154_v4   ;;  %v165_v27 = vld [vmem:[%s573_s1 + $0x60] sm:$0xff]  ;;  %v420_v45 = vmov 1326507024   ;;  %v166_v48 = vld [vmem:[%s573_s1 + $0x68] sm:$0xff]  ;;  %v168_v59 = vld [vmem:[%s573_s1 + $0x78] sm:$0xff] }
   0x7   :  { %v28_v14 = vand.u32 2139095040, %v468_v10  ;;  %v25_v19 = vand.u32 2147483647, %v468_v10  ;;  %vm27_vm8 = vcmp.lt.s32.totalorder %v468_v10, 0  ;;  %vm117_vm5 = vweird.f32 %v468_v10 }
   0x9   :  { %v29_v15 = vshrl.u32 %v28_v14, 23  ;;  %v32_v24 = vand.u32 8388607, %v25_v19  ;;  %vm26_vm9 = vcmp.le.f32.partialorder %v25_v19, 0.7853982 }
   0xa   :  { %190 = vperm.xlu1 %406, %v158_v6   ;;  %187 = vperm.xlu0 %405, %v157_v7  }
   0xb   :  { %v326_v18 = vadd.s32 4294967169, %v29_v15  ;;  %v33_v40 = vor.u32 8388608, %v32_v24 }
   0xd   :  { %v35_v20 = vadd.s32 1, %v326_v18  ;;  %v73_v56 = vshll.u32 %v33_v40, 8 }
   0xe   :  { %196 = vperm.xlu1 %406, %v160_v11   ;;  %193 = vperm.xlu0 %405, %v159_v12  }
   0xf   :  { %vm36_vm0 = vcmp.gt.s32.totalorder %v35_v20, 0 }
  0x10   :  { %v37_v23 = vsel %vm36_vm0, %v35_v20, 0 }
  0x11   :  { %v39_v25 = vand.u32 31, %v37_v23  ;;  %v38_v26 = vshrl.u32 %v37_v23, 5 }
  0x12   :  { %199 = vperm.xlu1 %406, %v161_v17   ;;  %134 = vperm.xlu0 %405, %v130_v16  }
  0x13   :  { %v40_v29 = vsub.s32 32, %v39_v25  ;;  %v42_v31 = vshll.u32 %v415_v30, %v39_v25  ;;  %v45_v33 = vshll.u32 %v416_v32, %v39_v25  ;;  %v48_v35 = vshll.u32 %v417_v34, %v39_v25 }
  0x14   :  { %v51_v37 = vshll.u32 %v418_v36, %v39_v25  ;;  %v54_v39 = vshll.u32 %v419_v38, %v39_v25  ;;  %vm57_vm1 = vcmp.lt.s32.totalorder %v38_v26, 1  ;;  %vm60_vm2 = vcmp.lt.s32.totalorder %v38_v26, 4 }
  0x15   :  { %v43_v41 = vshrl.u32 %v416_v32, %v40_v29  ;;  %v46_v42 = vshrl.u32 %v417_v34, %v40_v29  ;;  %v49_v43 = vshrl.u32 %v418_v36, %v40_v29  ;;  %v52_v44 = vshrl.u32 %v419_v38, %v40_v29 }
  0x16   :  { %205 = vperm.xlu1 %406, %v163_v21   ;;  %202 = vperm.xlu0 %405, %v162_v22   ;;  %v55_v46 = vshrl.u32 %v420_v45, %v40_v29  ;;  %vm59_vm3 = vcmp.lt.s32.totalorder %v38_v26, 3  ;;  %vm58_vm4 = vcmp.lt.s32.totalorder %v38_v26, 2  ;;  %v41_v62 = vshrl.u32 %v415_v30, %v40_v29 }
  0x17   :  { %v44_v49 = vor.u32 %v43_v41, %v42_v31  ;;  %v47_v50 = vor.u32 %v46_v42, %v45_v33  ;;  %v50_v51 = vor.u32 %v49_v43, %v48_v35  ;;  %v53_v52 = vor.u32 %v52_v44, %v51_v37 }
  0x18   :  { %v56_v53 = vor.u32 %v55_v46, %v54_v39  ;;  %v138_v42 = vlaneseq }
  0x19   :  { %v65_v54 = vsel %vm57_vm1, %v44_v49, %v47_v50  ;;  %v69_v55 = vsel %vm57_vm1, %v47_v50, %v50_v51  ;;  %v66_v57 = vsel %vm60_vm2, %v53_v52, 920167782  ;;  %v62_v63 = vsel %vm60_vm2, %v50_v51, 2102212464 }
  0x1a   :  { %211 = vperm.xlu1 %406, %v165_v27   ;;  %208 = vperm.xlu0 %405, %v164_v28   ;;  %v70_v58 = vsel %vm60_vm2, %v56_v53, 1326507024  ;;  %v67_v60 = vsel %vm59_vm3, %v50_v51, %v66_v57  ;;  %v61_v7 = vsel %vm57_vm1, %v41_v62, %v44_v49  ;;  %v63_v8 = vsel %vm59_vm3, %v47_v50, %v62_v63 }
  0x1b   :  { %v71_v61 = vsel %vm59_vm3, %v53_v52, %v70_v58  ;;  %v68_v0 = vsel %vm58_vm4, %v65_v54, %v67_v60  ;;  %v64_v11 = vsel %vm58_vm4, %v61_v7, %v63_v8  ;;  %v139_v19 = vshrl.u32 %v138_v42, 7 }
  0x1c   :  { %v72_v1 = vsel %vm58_vm4, %v69_v55, %v71_v61  ;;  %v519_v4 = vmul.u32.u64.low %v73_v56, %v68_v0  ;;  %v520_v6 = vmul.u32.u64.high %v73_v56, %v68_v0, %v519_v4  ;;  %v80_v13 = vmul.u32 %v73_v56, %v64_v11 }
  0x1d   :  { %v516_v2 = vmul.u32.u64.low %v73_v56, %v72_v1  ;;  %v517_v3 = vmul.u32.u64.high %v73_v56, %v72_v1, %v516_v2  ;;  %v422_v55 = vmov 1.0|1.0   ;;  %v140_v58 = vsub.s32 0, %v139_v19 }
  0x1e   :  { %217 = vperm.xlu1 %406, %v167_v47   ;;  %214 = vperm.xlu0 %405, %v166_v48   ;;  %v83_v12 = vadd.s32 1, %v520_v6  ;;  %v534_v47 = vand.u32 127, %v138_v42 }
  0x1f   :  { %vm82_vm6 = vc.u32 %v517_v3, %v519_v4  ;;  %v81_v27 = vadd.s32 %v519_v4, %v517_v3 }
  0x20   :  { %v84_v14 = vsel %vm82_vm6, %v83_v12, %v520_v6 }
  0x21   :  { %v85_v15 = vadd.s32 %v84_v14, %v80_v13 }
  0x22   :  { %220 = vperm.xlu0 %405, %v168_v59   ;;  %v131_v59 = vmul.f32 %v458_v5, %v458_v5 }
  0x23   :  { %v86_v16 = vadd.s32 536870912, %v85_v15 }
  0x24   :  { %v141_v0 = vrot.slane %v131_v59, %v140_v58 }
  0x25   :  { %v87_v17 = vshrl.u32 %v86_v16, 30 }
  0x27   :  { %v88_v18 = vshll.u32 %v87_v17, 30  ;;  %v111_v41 = vsub.s32 4, %v87_v17 }
  0x29   :  { %v89_v20 = vsub.s32 %v85_v15, %v88_v18  ;;  %v112_v43 = vsel %vm27_vm8, %v111_v41, %v87_v17 }
  0x2a   :  { %v114_v46 = vsel %vm26_vm9, 0, %v112_v43 }
  0x2b   :  { %v91_v21 = vsub.s32 0, %v89_v20  ;;  %v118_v52 = vand.u32 3, %v114_v46 }
  0x2d   :  { %v327_v22 = vmin.u32 %v91_v21, %v89_v20  ;;  %vm120_vm15 = vcmp.eq.s32.totalorder %v118_v52, 0  ;;  %vm123_vm0 = vcmp.eq.s32.totalorder %v118_v52, 2  ;;  %vm119_vm2 = vcmp.lt.s32.totalorder %v118_v52, 2 }
  0x2f   :  { %v93_v23 = vclz %v327_v22 }
  0x31   :  { %v328_v24 = vadd.s32 4294967294, %v93_v23 }
  0x33   :  { %vm329_vm7 = vcmp.lt.s32.totalorder %v328_v24, 0 }
  0x34   :  { %v96_v25 = vsel %vm329_vm7, 0, %v328_v24 }
  0x35   :  { %v101_v26 = vsub.s32 4294967266, %v96_v25  ;;  %v97_v28 = vsub.s32 32, %v96_v25  ;;  %v98_v30 = vshll.u32 %v89_v20, %v96_v25 }
  0x37   :  { %v102_v29 = vadd.s32 127, %v101_v26  ;;  %v99_v31 = vshrl.u32 %v81_v27, %v97_v28 }
  0x39   :  { %v103_v32 = vshll.u32 %v102_v29, 23  ;;  %v100_v33 = vor.u32 %v99_v31, %v98_v30 }
  0x3b   :  { %v104_v34 = vor.u32 4788187, %v103_v32  ;;  %v107_v36 = vcvt.s32.f32 %v100_v33 }
  0x3d   :  { %v105_v35 = vand.u32 2147483647, %v104_v34 }
  0x3f   :  { %v108_v37 = vmul.f32 %v107_v36, %v105_v35 }
  0x41   :  { %v109_v38 = vxor.u32 2147483648, %v108_v37 }
  0x43   :  { %v110_v39 = vsel %vm27_vm8, %v109_v38, %v108_v37 }
  0x44   :  { %v113_v40 = vsel %vm26_vm9, %v468_v10, %v110_v39 }
  0x45   :  { %407 = vcosq.f32 %v113_v40 }
  0x46   :  { %409 = vsinq.f32 %v113_v40 }
  0x4f   :  { %v408_v48 = vpop.eup %407 }
  0x50   :  { %v410_v49 = vpop.eup %409  ;;  %v124_v54 = vxor.u32 2147483648, %v408_v48 }
  0x51   :  { %v121_v53 = vxor.u32 2147483648, %v410_v49 }
  0x52   :  { %v125_v61 = vsel %vm123_vm0, %v124_v54, %v410_v49 }
  0x53   :  { %v122_v60 = vsel %vm120_vm15, %v408_v48, %v121_v53 }
  0x54   :  { %v126_v1 = vsel %vm119_vm2, %v122_v60, %v125_v61 }
  0x55   :  { %v127_v4 = vsel %vm117_vm5, nan, %v126_v1 }
  0x56   :  { %v128_v8 = vmul.f32 0.5, %v127_v4 }
  0x58   :  { %v129_v13 = vadd.f32 0.5, %v128_v8 }
  0x5a   :  { %v150_v15 = vrot.slane %v129_v13, %v140_v58 }
  0x81   :  { %v182_v44 = vpop.permute.xlu1 %181  ;;  %v176_v45 = vpop.permute.xlu0 %175 }
  0x82   :  { %vm222_vm11 = vcmp.eq.s32.totalorder %v534_v47, %v176_v45  ;;  %vm224_vm13 = vcmp.eq.s32.totalorder %v534_v47, %v182_v44 }
  0x85   :  { %v185_v50 = vpop.permute.xlu1 %184  ;;  %v179_v51 = vpop.permute.xlu0 %178 }
  0x86   :  { %vm223_vm10 = vcmp.eq.s32.totalorder %v534_v47, %v179_v51  ;;  %vm225_vm14 = vcmp.eq.s32.totalorder %v534_v47, %v185_v50 }
  0x87   :  { %vm346_vm12 = vmpackc.low %vm223_vm10, %vm222_vm11 }
  0x88   :  { %372 = vmatpush3.bf16.msk.msra.mxu0 %vm346_vm12, %v422_v55  ;;  %vm348_vm1 = vmpackc.low %vm225_vm14, %vm224_vm13 }
  0x89   :  { %v191_v56 = vpop.permute.xlu1 %190  ;;  %v188_v57 = vpop.permute.xlu0 %187  ;;  %373 = vmatprep.subr.bf16.mxu0 %v414_v9 }
  0x8a   :  { %vm227_vm3 = vcmp.eq.s32.totalorder %v534_v47, %v191_v56  ;;  %vm226_vm4 = vcmp.eq.s32.totalorder %v534_v47, %v188_v57 }
  0x8b   :  { %vm350_vm6 = vmpackc.low %vm227_vm3, %vm226_vm4 }
  0x8c   :  { %374 = vmatpush3.bf16.msk.msra.mxu0 %vm348_vm1, %v422_v55 }
  0x8d   :  { %v197_v62 = vpop.permute.xlu1 %196  ;;  %v194_v63 = vpop.permute.xlu0 %193  ;;  %375 = vmatprep.subr.bf16.mxu0 %v414_v9 }
  0x8e   :  { %vm229_vm7 = vcmp.eq.s32.totalorder %v534_v47, %v197_v62  ;;  %vm228_vm8 = vcmp.eq.s32.totalorder %v534_v47, %v194_v63 }
  0x8f   :  { %vm352_vm9 = vmpackc.low %vm229_vm7, %vm228_vm8 }
  0x90   :  { %376 = vmatpush3.bf16.msk.msra.mxu0 %vm350_vm6, %v422_v55 }
  0x91   :  { %v200_v5 = vpop.permute.xlu1 %199  ;;  %v135_v2 = vpop.permute.xlu0 %134  ;;  %377 = vmatprep.subr.bf16.mxu0 %v414_v9 }
  0x92   :  { %v143_v3 = vmul.f32 %v141_v0, %v135_v2  ;;  %vm230_vm10 = vcmp.eq.s32.totalorder %v534_v47, %v200_v5 }
  0x94   :  { %v144_v6 = vmul.f32 1.442695, %v143_v3  ;;  %378 = vmatpush3.bf16.msk.msra.mxu0 %vm352_vm9, %v422_v55 }
  0x95   :  { %v206_v7 = vpop.permute.xlu1 %205  ;;  %v203_v10 = vpop.permute.xlu0 %202  ;;  %379 = vmatprep.subr.bf16.mxu0 %v414_v9 }
  0x96   :  { %411 = vpow2.f32 %v144_v6  ;;  %vm231_vm11 = vcmp.eq.s32.totalorder %v534_v47, %v203_v10  ;;  %vm232_vm13 = vcmp.eq.s32.totalorder %v534_v47, %v206_v7 }
  0x97   :  { %vm354_vm12 = vmpackc.low %vm231_vm11, %vm230_vm10 }
  0x98   :  { %380 = vmatpush3.bf16.msk.msra.mxu0 %vm354_vm12, %v422_v55 }
  0x99   :  { %v212_v11 = vpop.permute.xlu1 %211  ;;  %v209_v12 = vpop.permute.xlu0 %208  ;;  %381 = vmatprep.subr.bf16.mxu0 %v414_v9 }
  0x9a   :  { %vm233_vm14 = vcmp.eq.s32.totalorder %v534_v47, %v209_v12  ;;  %vm234_vm0 = vcmp.eq.s32.totalorder %v534_v47, %v212_v11 }
  0x9b   :  { %vm356_vm15 = vmpackc.low %vm233_vm14, %vm232_vm13 }
  0x9c   :  { %382 = vmatpush3.bf16.msk.msra.mxu0 %vm356_vm15, %v422_v55 }
  0x9d   :  { %v215_v14 = vpop.permute.xlu0 %214  ;;  %383 = vmatprep.subr.bf16.mxu0 %v414_v9  ;;  %v218_v16 = vpop.permute.xlu1 %217 }
  0x9e   :  { %vm235_vm1 = vcmp.eq.s32.totalorder %v534_v47, %v215_v14  ;;  %vm236_vm3 = vcmp.eq.s32.totalorder %v534_v47, %v218_v16 }
  0x9f   :  { %vm358_vm2 = vmpackc.low %vm235_vm1, %vm234_vm0 }
  0xa0   :  { %v412_v17 = vpop.eup %411  ;;  %384 = vmatpush3.bf16.msk.msra.mxu0 %vm358_vm2, %v422_v55 }
  0xa1   :  { %v221_v18 = vpop.permute.xlu0 %220  ;;  %v152_v20 = vmul.f32 %v412_v17, %v150_v15  ;;  %385 = vmatprep.subr.bf16.mxu0 %v414_v9 }
  0xa2   :  { %vm237_vm4 = vcmp.eq.s32.totalorder %v534_v47, %v221_v18 }
  0xa3   :  { %vm360_vm5 = vmpackc.low %vm237_vm4, %vm236_vm3  ;;  %v279_v21 = vpack.c.bf16 %v152_v20, %v152_v20 }
  0xa4   :  { %386 = vmatpush3.bf16.msk.msra.mxu0 %vm360_vm5, %v422_v55 }
  0xa7   :  { %388 = vmatmul.mubr.bf16.vlgmr.msra.gmra.mrb[0].mxu0 %v279_v21 }
 0x17a   :  { %v314_v22 = vpop.f32.mrb[0].mxu0 }
 0x17b   :  { %v389_v23 = vpop.f32.mrb[1].mxu0  ;;  %321 = vst [vmem:[%s576_s3] sm:$0xff] %v314_v22 }
 0x17c   :  { %v317_v24 = vpop.f32.mrb[2].mxu0 }
 0x17d   :  { %v390_v25 = vpop.f32.mrb[3].mxu0 }

// kernel: _lambda_.2
= control target key start
LH: loop header
LB: loop body
LE: loop exit
PB: predicated region body
PF: predicated region fallthrough
CT: control target
= control target key end

     0   :  { %v1583_v0 = vmov 1   ;;  %v1584_v1 = vmov 0   ;;  %v1585_v6 = vmov 3   ;;  %v1586_v9 = vmov 2   ;;  %s2499_s2 = inlined_call_operand.vmem [shape: f32[18,4], index: 2, kind: input, shape index: {}]   ;;  %s2500_s1 = inlined_call_operand.vmem [shape: s32[384,1], index: 1, kind: input, shape index: {}]   ;;  %s2501_s0 = inlined_call_operand.vmem [shape: f32[3,384], index: 0, kind: input, shape index: {}]   ;;  %s2502_s3 = inlined_call_operand.vmem [shape: f32[18,128], index: 3, kind: output, shape index: {}]  }
   0x1   :  { %1526 = vset.pattern.permute.xlu0 %v1583_v0  ;;  %1525 = vset.pattern.permute.xlu1 %v1584_v1  ;;  %v1620_v2 = vld [vmem:[%s2499_s2] sm:$0xff]  ;;  %v840_v4 = vld [vmem:[%s2500_s1 + $0x8] sm:$0xff]  ;;  %v858_v7 = vld [vmem:[%s2500_s1 + $0x98] sm:$0xff] }
   0x2   :  { %v839_v3 = vld [vmem:[%s2500_s1] sm:$0xff]  ;;  %632 = vperm.xlu0 %1526, %v1620_v2   ;;  %v1632_v5 = vld [vmem:[%s2499_s2 + $0x8] sm:$0xff]  ;;  %v842_v10 = vld [vmem:[%s2500_s1 + $0x18] sm:$0xff]  ;;  %vm720_vm12 = vcmp.eq.f32.partialorder %v1620_v2, 2.0 }
   0x3   :  { %893 = vperm.xlu1 %1525, %v839_v3   ;;  %vm721_vm0 = vcmp.eq.f32.partialorder %v1632_v5, 2.0  ;;  %vm718_vm1 = vcmp.eq.f32.partialorder %v1632_v5, 1.0  ;;  %v1649_v11 = vld [vmem:[%s2499_s2 + $0x10] sm:$0x3]  ;;  %v860_v13 = vld [vmem:[%s2500_s1 + $0xa8] sm:$0xff]  ;;  %v855_v28 = vld [vmem:[%s2500_s1 + $0x80] sm:$0xff] }
   0x4   :  { %v724_v8 = vsel %vm721_vm0, 1, %v1584_v1  ;;  %v748_v12 = vsel %vm718_vm1, 1, %v1584_v1  ;;  %vm722_vm2 = vcmp.eq.f32.partialorder %v1649_v11, 2.0  ;;  %v22_v15 = vld [vmem:[%s2501_s0] sm:$0x77]  ;;  %v872_v18 = vld [vmem:[%s2500_s1 + $0x108] sm:$0xff] }
   0x5   :  { %v725_v14 = vsel %vm722_vm2, 1, %v1584_v1  ;;  %v23_v16 = vld [vmem:[%s2501_s0 + $0x8] sm:$0x7]  ;;  %v27_v19 = vmul.f32 %v22_v15, %v22_v15  ;;  %v39_v21 = vmul.f32 2.0, %v22_v15  ;;  %v1319_v23 = vrot.slane %v22_v15, 9  ;;  %v857_v52 = vld [vmem:[%s2500_s1 + $0x90] sm:$0xff] }
   0x6   :  { %1533 = vset.pattern.permute.xlu0 %v1585_v6  ;;  %v78_v17 = vmul.f32 3.1415927, %v23_v16  ;;  %v28_v20 = vmul.f32 %v23_v16, %v23_v16  ;;  %v40_v22 = vmul.f32 2.0, %v23_v16  ;;  %v1320_v26 = vrot.slane %v23_v16, 9  ;;  %v844_v32 = vld [vmem:[%s2500_s1 + $0x28] sm:$0xff]  ;;  %v862_v55 = vld [vmem:[%s2500_s1 + $0xb8] sm:$0xff] }
   0x7   :  { %896 = vperm.xlu1 %1525, %v840_v4   ;;  %772 = vperm.xlu0 %1533, %v1620_v2   ;;  %v31_v24 = vrot.slane %v27_v19, 5  ;;  %v1321_v27 = vrot.slane %v22_v15, 10  ;;  %v49_v29 = vmul.f32 %v1319_v23, %v39_v21  ;;  %v1322_v30 = vrot.slane %v23_v16, 10  ;;  %v856_v41 = vld [vmem:[%s2500_s1 + $0x88] sm:$0xff]  ;;  %v841_v60 = vld [vmem:[%s2500_s1 + $0x10] sm:$0xff]  ;;  %v874_v63 = vld [vmem:[%s2500_s1 + $0x118] sm:$0xff] }
   0x8   :  { %v33_v25 = vrot.slane %v28_v20, 5  ;;  %v77_v31 = vmul.f32 3.1415927, %v22_v15  ;;  %v50_v35 = vmul.f32 %v1320_v26, %v40_v22  ;;  %v1672_v36 = vmul.f32 0.16666667, %v78_v17 }
   0x9   :  { %v32_v33 = vrot.slane %v31_v24, 4  ;;  %v57_v37 = vmul.f32 %v1321_v27, %v49_v29  ;;  %v557_v42 = vsub.f32 0.0, %v1632_v5  ;;  %v1587_v16 = vmov 683565275  }
   0xa   :  { %v34_v34 = vrot.slane %v33_v25, 4  ;;  %v1675_v38 = vmul.f32 0.16666667, %v77_v31  ;;  %v58_v43 = vmul.f32 %v1322_v30, %v50_v35  ;;  %v188_v47 = vand.u32 2139095040, %v1672_v36 }
   0xb   :  { %950 = vperm.xlu1 %1525, %v858_v7   ;;  %1534 = vset.pattern.permute.xlu0 %v1586_v9  ;;  %v37_v39 = vadd.f32 %v32_v33, %v27_v19  ;;  %v1589_v21 = vmov 2131351028   ;;  %v1590_v23 = vmov 2102212464   ;;  %v1591_v25 = vmov 920167782  }
   0xc   :  { %730 = vperm.xlu0 %1534, %v724_v8   ;;  %v38_v40 = vadd.f32 %v34_v34, %v28_v20  ;;  %v82_v44 = vand.u32 2147483647, %v1675_v38  ;;  %v85_v45 = vand.u32 2139095040, %v1675_v38  ;;  %v189_v57 = vshrl.u32 %v188_v47, 23 }
   0xd   :  { %v59_v46 = vsub.f32 %v37_v39, %v57_v37  ;;  %v871_v37 = vld [vmem:[%s2500_s1 + $0x100] sm:$0xff] }
   0xe   :  { %v60_v48 = vsub.f32 %v38_v40, %v58_v43  ;;  %v86_v49 = vshrl.u32 %v85_v45, 23  ;;  %v89_v51 = vand.u32 8388607, %v82_v44  ;;  %v1327_v7 = vadd.s32 4294967169, %v189_v57 }
   0xf   :  { %902 = vperm.xlu1 %1525, %v842_v10   ;;  %v1684_v50 = vmax.f32 %v59_v46, 0.0 }
  0x10   :  { %754 = vperm.xlu0 %1534, %v748_v12   ;;  %v1691_v53 = vmax.f32 %v60_v48, 0.0  ;;  %v1323_v54 = vadd.s32 4294967169, %v86_v49  ;;  %v90_v62 = vor.u32 8388608, %v89_v51  ;;  %v195_v27 = vadd.s32 1, %v1327_v7 }
  0x11   :  { %v552_v56 = vadd.f32 %v1684_v50, %v27_v19  ;;  %1542 = vrsqrt.f32 %v1684_v50  ;;  %vm65_vm4 = vcmp.eq.f32.partialorder %v1684_v50, inf  ;;  %vm67_vm5 = vcmp.eq.f32.partialorder %v1684_v50, 0.0 }
  0x12   :  { %v553_v58 = vadd.f32 %v1691_v53, %v28_v20  ;;  %v92_v59 = vadd.s32 1, %v1323_v54  ;;  %v68_v10 = vand.u32 2147483648, %v1684_v50  ;;  %1544 = vrsqrt.f32 %v1691_v53  ;;  %v846_v20 = vld [vmem:[%s2500_s1 + $0x38] sm:$0xff] }
  0x13   :  { %956 = vperm.xlu1 %1525, %v860_v13   ;;  %v1702_v61 = vadd.f32 %v552_v56, %v32_v33  ;;  %v1712_v13 = vshll.u32 %v90_v62, 8  ;;  %v843_v56 = vld [vmem:[%s2500_s1 + $0x20] sm:$0xff]  ;;  %vm196_vm10 = vcmp.gt.s32.totalorder %v195_v27, 0  ;;  %vm72_vm13 = vcmp.eq.f32.partialorder %v1691_v53, inf }
  0x14   :  { %733 = vperm.xlu0 %1534, %v725_v14   ;;  %v1707_v3 = vadd.f32 %v553_v58, %v34_v34  ;;  %vm93_vm3 = vcmp.gt.s32.totalorder %v92_v59, 0  ;;  %v859_v14 = vld [vmem:[%s2500_s1 + $0xa0] sm:$0xff]  ;;  %v1592_v34 = vmov 1326507024  }
  0x15   :  { %v94_v4 = vsel %vm93_vm3, %v92_v59, 0  ;;  %vm74_vm3 = vcmp.eq.f32.partialorder %v1691_v53, 0.0 }
  0x16   :  { %v96_v8 = vand.u32 31, %v94_v4  ;;  %v95_v12 = vshrl.u32 %v94_v4, 5 }
  0x17   :  { %992 = vperm.xlu1 %1525, %v872_v18   ;;  %v1588_v18 = vmov 2475754826  }
  0x18   :  { %1537 = vset.pattern.permute.xlu0 %v1584_v1  ;;  %v97_v15 = vsub.s32 32, %v96_v8  ;;  %v99_v17 = vshll.u32 %v1587_v16, %v96_v8  ;;  %v102_v19 = vshll.u32 %v1588_v18, %v96_v8  ;;  %v105_v22 = vshll.u32 %v1589_v21, %v96_v8 }
  0x19   :  { %941 = vperm.xlu0 %1537, %v855_v28   ;;  %v108_v24 = vshll.u32 %v1590_v23, %v96_v8  ;;  %v111_v26 = vshll.u32 %v1591_v25, %v96_v8  ;;  %vm114_vm6 = vcmp.lt.s32.totalorder %v95_v12, 1  ;;  %vm115_vm7 = vcmp.lt.s32.totalorder %v95_v12, 2 }
  0x1a   :  { %v98_v28 = vshrl.u32 %v1587_v16, %v97_v15  ;;  %v100_v29 = vshrl.u32 %v1588_v18, %v97_v15  ;;  %v103_v30 = vshrl.u32 %v1589_v21, %v97_v15  ;;  %v106_v31 = vshrl.u32 %v1590_v23, %v97_v15 }
  0x1b   :  { %908 = vperm.xlu1 %1525, %v844_v32   ;;  %v1543_v32 = vpop.eup %1542  ;;  %v109_v33 = vshrl.u32 %v1591_v25, %v97_v15  ;;  %v112_v35 = vshrl.u32 %v1592_v34, %v97_v15  ;;  %vm116_vm8 = vcmp.lt.s32.totalorder %v95_v12, 3  ;;  %vm117_vm9 = vcmp.lt.s32.totalorder %v95_v12, 4 }
  0x1c   :  { %v64_v39 = vmul.f32 %v1543_v32, %v1684_v50  ;;  %v101_v40 = vor.u32 %v100_v29, %v99_v17  ;;  %v556_v15 = vsub.f32 0.0, %v1620_v2 }
  0x1d   :  { %944 = vperm.xlu0 %1537, %v856_v41   ;;  %v104_v41 = vor.u32 %v103_v30, %v102_v19  ;;  %v110_v43 = vor.u32 %v109_v33, %v108_v24  ;;  %v113_v45 = vor.u32 %v112_v35, %v111_v26  ;;  %v197_v24 = vsel %vm196_vm10, %v195_v27, 0  ;;  %v875_v30 = vld [vmem:[%s2500_s1 + $0x120] sm:$0xff] }
  0x1e   :  { %v66_v46 = vsel %vm65_vm4, %v1684_v50, %v64_v39  ;;  %v118_v47 = vsel %vm114_vm6, %v98_v28, %v101_v40  ;;  %v1784_v32 = vand.u32 31, %v197_v24  ;;  %vm717_vm10 = vcmp.eq.f32.partialorder %v1620_v2, 1.0 }
  0x1f   :  { %566 = vperm.xlu1 %1525, %v557_v42   ;;  %v107_v42 = vor.u32 %v106_v31, %v105_v22  ;;  %v122_v49 = vsel %vm114_vm6, %v101_v40, %v104_v41  ;;  %v1743_v51 = vsel %vm67_vm5, %v68_v10, %v66_v46  ;;  %v123_v54 = vsel %vm117_vm9, %v110_v43, 920167782 }
  0x20   :  { %v127_v58 = vsel %vm117_vm9, %v113_v45, 1326507024  ;;  %v292_v59 = vmul.f32 3.1415927, %v1743_v51  ;;  %v2503_v22 = vand.u32 2147483647, %v1672_v36 }
  0x21   :  { %947 = vperm.xlu0 %1537, %v857_v52   ;;  %v119_v48 = vsel %vm117_vm9, %v107_v42, 2102212464  ;;  %v124_v57 = vsel %vm116_vm8, %v107_v42, %v123_v54  ;;  %v128_v62 = vsel %vm116_vm8, %v110_v43, %v127_v58  ;;  %v1802_v46 = vsub.s32 32, %v1784_v32 }
  0x22   :  { %v120_v52 = vsel %vm116_vm8, %v104_v41, %v119_v48  ;;  %v1762_v10 = vmul.f32 0.16666667, %v292_v59  ;;  %v1792_v35 = vand.u32 8388607, %v2503_v22  ;;  %v1808_v48 = vsel %vm720_vm12, 1, %v1584_v1 }
  0x23   :  { %962 = vperm.xlu1 %1525, %v862_v55   ;;  %v126_v55 = vsel %vm114_vm6, %v104_v41, %v107_v42  ;;  %v121_v50 = vsel %vm115_vm7, %v118_v47, %v120_v52  ;;  %v876_v41 = vld [vmem:[%s2500_s1 + $0x128] sm:$0xff]  ;;  %v558_v42 = vsub.f32 0.0, %v1649_v11  ;;  %v873_v47 = vld [vmem:[%s2500_s1 + $0x110] sm:$0xff]  ;;  %v209_v22 = vshrl.u32 %v1590_v23, %v1802_v46 }
  0x24   :  { %v129_v4 = vsel %vm115_vm7, %v126_v55, %v128_v62  ;;  %v296_v12 = vand.u32 2147483647, %v1762_v10  ;;  %v137_v26 = vmul.u32 %v1712_v13, %v121_v50  ;;  %v193_v52 = vor.u32 8388608, %v1792_v35  ;;  %v848_v62 = vld [vmem:[%s2500_s1 + $0x48] sm:$0xff] }
  0x25   :  { %899 = vperm.xlu0 %1537, %v841_v60   ;;  %v125_v60 = vsel %vm115_vm7, %v122_v49, %v124_v57  ;;  %v1769_v17 = vmul.u32.u64.low %v1712_v13, %v129_v4  ;;  %v1770_v19 = vmul.u32.u64.high %v1712_v13, %v129_v4, %v1769_v17  ;;  %v75_v49 = vand.u32 2147483648, %v1691_v53 }
  0x26   :  { %v1759_v7 = vmul.u32.u64.low %v1712_v13, %v125_v60  ;;  %v1760_v8 = vmul.u32.u64.high %v1712_v13, %v125_v60, %v1759_v7  ;;  %v303_v31 = vand.u32 8388607, %v296_v12  ;;  %v861_v13 = vld [vmem:[%s2500_s1 + $0xb0] sm:$0xff]  ;;  %v1817_v57 = vshrl.u32 %v197_v24, 5 }
  0x27   :  { %998 = vperm.xlu1 %1525, %v874_v63   ;;  %v1545_v63 = vpop.eup %1544  ;;  %v202_v50 = vshll.u32 %v1587_v16, %v1784_v32  ;;  %v1826_v60 = vshll.u32 %v1588_v18, %v1784_v32  ;;  %vm2005_vm12 = vcmp.le.f32.partialorder %v82_v44, 0.7853982 }
  0x28   :  { %v140_v28 = vadd.s32 1, %v1760_v8  ;;  %vm139_vm11 = vc.u32 %v1770_v19, %v1759_v7  ;;  %v71_v39 = vmul.f32 %v1545_v63, %v1691_v53  ;;  %v304_v45 = vor.u32 8388608, %v303_v31 }
  0x29   :  { %953 = vperm.xlu0 %1537, %v859_v14   ;;  %v863_v14 = vld [vmem:[%s2500_s1 + $0xc0] sm:$0xff]  ;;  %v1820_v58 = vadd.s32 %v1759_v7, %v1770_v19  ;;  %v203_v7 = vshrl.u32 %v1588_v18, %v1802_v46  ;;  %vm217_vm5 = vcmp.lt.s32.totalorder %v1817_v57, 1  ;;  %vm220_vm6 = vcmp.lt.s32.totalorder %v1817_v57, 4 }
  0x2a   :  { %v141_v27 = vsel %vm139_vm11, %v140_v28, %v1760_v8  ;;  %v1832_v4 = vshll.u32 %v304_v45, 8  ;;  %v1838_v8 = vshrl.u32 %v1589_v21, %v1802_v46  ;;  %vm218_vm8 = vcmp.lt.s32.totalorder %v1817_v57, 2 }
  0x2b   :  { %914 = vperm.xlu1 %1525, %v846_v20   ;;  %v299_v20 = vand.u32 2139095040, %v1762_v10  ;;  %vm219_vm9 = vcmp.lt.s32.totalorder %v1817_v57, 3  ;;  %vm84_vm11 = vcmp.lt.s32.totalorder %v1675_v38, 0 }
  0x2d   :  { %989 = vperm.xlu0 %1537, %v871_v37   ;;  %v300_v29 = vshrl.u32 %v299_v20, 23  ;;  %v142_v37 = vadd.s32 %v141_v27, %v137_v26 }
  0x2f   :  { %1527 = vset.pattern.permute.xlu1 %v1583_v0  ;;  %v1331_v33 = vadd.s32 4294967169, %v300_v29  ;;  %v143_v43 = vadd.s32 536870912, %v142_v37  ;;  %v1851_v29 = vshll.u32 %v1589_v21, %v1784_v32 }
  0x30   :  { %637 = vperm.xlu1 %1527, %v1632_v5  }
  0x31   :  { %905 = vperm.xlu0 %1537, %v843_v56   ;;  %v306_v40 = vadd.s32 1, %v1331_v33  ;;  %v1812_v54 = vshrl.u32 %v143_v43, 30  ;;  %v1815_v56 = vsel %vm72_vm13, %v1691_v53, %v71_v39  ;;  %v865_v33 = vld [vmem:[%s2500_s1 + $0xd0] sm:$0xff]  ;;  %v864_v43 = vld [vmem:[%s2500_s1 + $0xc8] sm:$0xff]  ;;  %v878_v53 = vld [vmem:[%s2500_s1 + $0x138] sm:$0xff] }
  0x33   :  { %vm307_vm14 = vcmp.gt.s32.totalorder %v306_v40, 0  ;;  %v145_v63 = vshll.u32 %v1812_v54, 30 }
  0x34   :  { %1528 = vset.pattern.permute.xlu1 %v1584_v1  ;;  %v308_v55 = vsel %vm307_vm14, %v306_v40, 0 }
  0x35   :  { %965 = vperm.xlu1 %1528, %v863_v14   ;;  %561 = vperm.xlu0 %1537, %v556_v15   ;;  %v310_v59 = vand.u32 31, %v308_v55  ;;  %v845_v14 = vld [vmem:[%s2500_s1 + $0x30] sm:$0xff]  ;;  %v309_v15 = vshrl.u32 %v308_v55, 5  ;;  %v1845_v24 = vsub.s32 %v142_v37, %v145_v63 }
  0x37   :  { %v311_v17 = vsub.s32 32, %v310_v59  ;;  %v313_v19 = vshll.u32 %v1587_v16, %v310_v59  ;;  %v316_v20 = vshll.u32 %v1588_v18, %v310_v59  ;;  %v319_v26 = vshll.u32 %v1589_v21, %v310_v59 }
  0x38   :  { %v322_v28 = vshll.u32 %v1590_v23, %v310_v59  ;;  %v148_v37 = vsub.s32 0, %v1845_v24  ;;  %v325_v40 = vshll.u32 %v1591_v25, %v310_v59  ;;  %vm328_vm15 = vcmp.lt.s32.totalorder %v309_v15, 1 }
  0x39   :  { %1001 = vperm.xlu1 %1528, %v875_v30   ;;  %959 = vperm.xlu0 %1537, %v861_v13   ;;  %v312_v30 = vshrl.u32 %v1587_v16, %v311_v17  ;;  %v314_v31 = vshrl.u32 %v1588_v18, %v311_v17  ;;  %v317_v13 = vshrl.u32 %v1589_v21, %v311_v17  ;;  %vm329_vm0 = vcmp.lt.s32.totalorder %v309_v15, 2 }
  0x3a   :  { %v320_v27 = vshrl.u32 %v1590_v23, %v311_v17  ;;  %v323_v39 = vshrl.u32 %v1591_v25, %v311_v17  ;;  %vm330_vm1 = vcmp.lt.s32.totalorder %v309_v15, 3  ;;  %vm331_vm2 = vcmp.lt.s32.totalorder %v309_v15, 4 }
  0x3b   :  { %v315_v45 = vor.u32 %v314_v31, %v313_v19  ;;  %v847_v31 = vld [vmem:[%s2500_s1 + $0x40] sm:$0xff] }
  0x3c   :  { %v321_v55 = vor.u32 %v320_v27, %v319_v26  ;;  %v324_v63 = vor.u32 %v323_v39, %v322_v28 }
  0x3d   :  { %1004 = vperm.xlu1 %1528, %v876_v41   ;;  %995 = vperm.xlu0 %1537, %v873_v47   ;;  %v326_v41 = vshrl.u32 %v1592_v34, %v311_v17  ;;  %v318_v47 = vor.u32 %v317_v13, %v316_v20  ;;  %v877_v17 = vld [vmem:[%s2500_s1 + $0x130] sm:$0xff]  ;;  %v332_v20 = vsel %vm328_vm15, %v312_v30, %v315_v45 }
  0x3e   :  { %v333_v26 = vsel %vm331_vm2, %v321_v55, 2102212464  ;;  %v337_v28 = vsel %vm331_vm2, %v324_v63, 920167782  ;;  %v211_v30 = vshll.u32 %v1590_v23, %v1784_v32 }
  0x3f   :  { %v336_v59 = vsel %vm328_vm15, %v315_v45, %v318_v47  ;;  %v334_v13 = vsel %vm330_vm1, %v318_v47, %v333_v26  ;;  %v338_v27 = vsel %vm330_vm1, %v321_v55, %v337_v28 }
  0x41   :  { %920 = vperm.xlu1 %1528, %v848_v62   ;;  %911 = vperm.xlu0 %1537, %v845_v14   ;;  %v1324_v62 = vmin.u32 %v148_v37, %v1845_v24  ;;  %v327_v14 = vor.u32 %v326_v41, %v325_v40  ;;  %v339_v40 = vsel %vm329_vm0, %v336_v59, %v338_v27 }
  0x42   :  { %v1883_v41 = vor.u32 %v203_v7, %v202_v50  ;;  %v849_v50 = vld [vmem:[%s2500_s1 + $0x50] sm:$0xff]  ;;  %v335_v7 = vsel %vm329_vm0, %v332_v20, %v334_v13  ;;  %v207_v20 = vor.u32 %v1838_v8, %v1826_v60  ;;  %v866_v60 = vld [vmem:[%s2500_s1 + $0xd8] sm:$0xff] }
  0x43   :  { %v150_v19 = vclz %v1324_v62  ;;  %v341_v37 = vsel %vm331_vm2, %v327_v14, 1326507024  ;;  %v1889_v45 = vmul.u32.u64.low %v1832_v4, %v339_v40  ;;  %v1890_v62 = vmul.u32.u64.high %v1832_v4, %v339_v40, %v1889_v45 }
  0x44   :  { %v351_v15 = vmul.u32 %v1832_v4, %v335_v7  ;;  %v1942_v40 = vshll.u32 %v193_v52, 8 }
  0x45   :  { %971 = vperm.xlu1 %1528, %v865_v33   ;;  %968 = vperm.xlu0 %1537, %v864_v43   ;;  %v340_v33 = vsel %vm328_vm15, %v318_v47, %v321_v55  ;;  %v1325_v39 = vadd.s32 4294967294, %v150_v19  ;;  %v342_v43 = vsel %vm330_vm1, %v324_v63, %v341_v37  ;;  %v212_v47 = vshrl.u32 %v1591_v25, %v1802_v46 }
  0x46   :  { %v343_v55 = vsel %vm329_vm0, %v340_v33, %v342_v43  ;;  %v214_v63 = vshll.u32 %v1591_v25, %v1784_v32  ;;  %v215_v19 = vshrl.u32 %v1592_v34, %v1802_v46  ;;  %v354_v32 = vadd.s32 1, %v1890_v62 }
  0x47   :  { %vm1326_vm4 = vcmp.lt.s32.totalorder %v1325_v39, 0  ;;  %v213_v13 = vor.u32 %v212_v47, %v211_v30  ;;  %v1936_v37 = vsel %vm74_vm3, %v75_v49, %v1815_v56  ;;  %vm298_vm0 = vcmp.lt.s32.totalorder %v1762_v10, 0 }
  0x48   :  { %v153_v14 = vsel %vm1326_vm4, 0, %v1325_v39  ;;  %v293_v47 = vmul.f32 3.1415927, %v1936_v37  ;;  %vm2069_vm1 = vcmp.le.f32.partialorder %v296_v12, 0.7853982 }
  0x49   :  { %1007 = vperm.xlu1 %1528, %v877_v17   ;;  %917 = vperm.xlu0 %1537, %v847_v31   ;;  %v1903_v59 = vmul.u32.u64.low %v1832_v4, %v343_v55  ;;  %v1904_v17 = vmul.u32.u64.high %v1832_v4, %v343_v55, %v1903_v59  ;;  %v154_v26 = vsub.s32 32, %v153_v14  ;;  %v155_v28 = vshll.u32 %v1845_v24, %v153_v14 }
  0x4a   :  { %v158_v31 = vsub.s32 4294967266, %v153_v14  ;;  %v210_v24 = vor.u32 %v209_v22, %v1851_v29  ;;  %v216_v4 = vor.u32 %v215_v19, %v214_v63  ;;  %v225_v22 = vsel %vm217_vm5, %v1883_v41, %v207_v20  ;;  %v850_v19 = vld [vmem:[%s2500_s1 + $0x58] sm:$0xff] }
  0x4b   :  { %v156_v27 = vshrl.u32 %v1820_v58, %v154_v26  ;;  %vm353_vm7 = vc.u32 %v1904_v17, %v1889_v45  ;;  %v226_v39 = vsel %vm220_vm6, %v213_v13, 920167782 }
  0x4c   :  { %v159_v33 = vadd.s32 127, %v158_v31  ;;  %v355_v58 = vsel %vm353_vm7, %v354_v32, %v1890_v62  ;;  %v227_v62 = vsel %vm219_vm9, %v210_v24, %v226_v39  ;;  %v230_v35 = vsel %vm220_vm6, %v216_v4, 1326507024  ;;  %v852_v39 = vld [vmem:[%s2500_s1 + $0x68] sm:$0xff] }
  0x4d   :  { %923 = vperm.xlu1 %1528, %v849_v50   ;;  %571 = vperm.xlu0 %1537, %v558_v42   ;;  %v157_v42 = vor.u32 %v156_v27, %v155_v28  ;;  %v356_v29 = vadd.s32 %v355_v58, %v351_v15  ;;  %v228_v56 = vsel %vm218_vm8, %v225_v22, %v227_v62  ;;  %v222_v7 = vsel %vm220_vm6, %v210_v24, 2102212464  ;;  %v868_v27 = vld [vmem:[%s2500_s1 + $0xe8] sm:$0xff] }
  0x4e   :  { %v160_v8 = vshll.u32 %v159_v33, 23  ;;  %v1962_v55 = vmul.u32.u64.low %v1942_v40, %v228_v56  ;;  %v1963_v63 = vmul.u32.u64.high %v1942_v40, %v228_v56, %v1962_v55  ;;  %v231_v59 = vsel %vm219_vm9, %v213_v13, %v230_v35 }
  0x4f   :  { %v164_v43 = vcvt.s32.f32 %v157_v42  ;;  %v357_v49 = vadd.s32 536870912, %v356_v29  ;;  %v223_v2 = vsel %vm219_vm9, %v207_v20, %v222_v7  ;;  %v1982_v28 = vmul.f32 0.16666667, %v293_v47 }
  0x50   :  { %v161_v30 = vor.u32 4788187, %v160_v8  ;;  %v747_v31 = vsel %vm717_vm10, 1, %v1584_v1  ;;  %v243_v42 = vadd.s32 1, %v1963_v63  ;;  %v867_v8 = vld [vmem:[%s2500_s1 + $0xe0] sm:$0xff]  ;;  %v352_v47 = vadd.s32 %v1889_v45, %v1904_v17  ;;  %v853_v45 = vld [vmem:[%s2500_s1 + $0x70] sm:$0xff] }
  0x51   :  { %1529 = vset.pattern.permute.xlu1 %v1586_v9  ;;  %974 = vperm.xlu0 %1537, %v866_v60   ;;  %v1957_v50 = vshrl.u32 %v357_v49, 30  ;;  %v402_v60 = vand.u32 2139095040, %v1982_v28  ;;  %v879_v49 = vld [vmem:[%s2500_s1 + $0x140] sm:$0xff]  ;;  %vm174_vm10 = vweird.f32 %v1675_v38 }
  0x52   :  { %727 = vperm.xlu1 %1529, %v1808_v48   ;;  %v162_v52 = vand.u32 2147483647, %v161_v30  ;;  %v201_v48 = vshrl.u32 %v1587_v16, %v1802_v46  ;;  %v229_v46 = vsel %vm217_vm5, %v207_v20, %v210_v24  ;;  %v168_v30 = vsub.s32 4, %v1812_v54 }
  0x53   :  { %v359_v26 = vshll.u32 %v1957_v50, 30  ;;  %v232_v32 = vsel %vm218_vm8, %v229_v46, %v231_v59 }
  0x54   :  { %v165_v14 = vmul.f32 %v164_v43, %v162_v52  ;;  %v1995_v33 = vmul.u32.u64.low %v1942_v40, %v232_v32  ;;  %v1996_v24 = vmul.u32.u64.high %v1942_v40, %v232_v32, %v1995_v33  ;;  %v881_v52 = vld [vmem:[%s2500_s1 + $0x150] sm:$0xff] }
  0x55   :  { %1010 = vperm.xlu0 %1537, %v878_v53   ;;  %v360_v15 = vsub.s32 %v356_v29, %v359_v26  ;;  %v403_v29 = vshrl.u32 %v402_v60, 23  ;;  %v880_v26 = vld [vmem:[%s2500_s1 + $0x148] sm:$0xff] }
  0x56   :  { %1530 = vset.pattern.permute.xlu1 %v1583_v0  ;;  %v221_v0 = vsel %vm217_vm5, %v201_v48, %v1883_v41  ;;  %v166_v13 = vxor.u32 2147483648, %v165_v14  ;;  %vm242_vm13 = vc.u32 %v1996_v24, %v1962_v55  ;;  %v169_v48 = vsel %vm84_vm11, %v168_v30, %v1812_v54  ;;  %v884_v60 = vld [vmem:[%s2500_s1 + $0x168] sm:$0xff] }
  0x57   :  { %642 = vperm.xlu1 %1530, %v1649_v11   ;;  %v362_v41 = vsub.s32 0, %v360_v15  ;;  %v224_v20 = vsel %vm218_vm8, %v221_v0, %v223_v2  ;;  %v1335_v44 = vadd.s32 4294967169, %v403_v29  ;;  %v244_v53 = vsel %vm242_vm13, %v243_v42, %v1963_v63 }
  0x58   :  { %v167_v58 = vsel %vm84_vm11, %v166_v13, %v165_v14  ;;  %v240_v22 = vmul.u32 %v1942_v40, %v224_v20 }
  0x59   :  { %926 = vperm.xlu0 %1537, %v850_v19   ;;  %v1332_v4 = vmin.u32 %v362_v41, %v360_v15  ;;  %v170_v62 = vsel %vm2005_vm12, %v1675_v38, %v167_v58  ;;  %v409_v35 = vadd.s32 1, %v1335_v44  ;;  %v399_v41 = vand.u32 2147483647, %v1982_v28 }
  0x5a   :  { %v245_v56 = vadd.s32 %v244_v53, %v240_v22  ;;  %1546 = vcosq.f32 %v170_v62 }
  0x5b   :  { %1531 = vset.pattern.permute.xlu1 %v1586_v9  ;;  %v364_v43 = vclz %v1332_v4  ;;  %vm410_vm15 = vcmp.gt.s32.totalorder %v409_v35, 0  ;;  %1548 = vsinq.f32 %v170_v62  ;;  %v406_v29 = vand.u32 8388607, %v399_v41  ;;  %v886_v62 = vld [vmem:[%s2500_s1 + $0x178] sm:$0xff] }
  0x5c   :  { %751 = vperm.xlu1 %1531, %v747_v31   ;;  %v246_v63 = vadd.s32 536870912, %v245_v56  ;;  %v411_v19 = vsel %vm410_vm15, %v409_v35, 0  ;;  %v171_v31 = vsel %vm2005_vm12, 0, %v169_v48  ;;  %vm719_vm12 = vcmp.eq.f32.partialorder %v1649_v11, 1.0 }
  0x5d   :  { %980 = vperm.xlu0 %1537, %v868_v27   ;;  %v1333_v40 = vadd.s32 4294967294, %v364_v43  ;;  %v413_v54 = vand.u32 31, %v411_v19  ;;  %v2052_v4 = vand.u32 3, %v171_v31  ;;  %v749_v11 = vsel %vm719_vm12, 1, %v1584_v1 }
  0x5e   :  { %v2037_v0 = vshrl.u32 %v246_v63, 30 }
  0x5f   :  { %vm1334_vm14 = vcmp.lt.s32.totalorder %v1333_v40, 0  ;;  %v414_v33 = vsub.s32 32, %v413_v54  ;;  %v416_v43 = vshll.u32 %v1587_v16, %v413_v54  ;;  %vm177_vm2 = vcmp.eq.s32.totalorder %v2052_v4, 0 }
  0x60   :  { %1532 = vset.pattern.permute.xlu1 %v1584_v1  ;;  %v367_v7 = vsel %vm1334_vm14, 0, %v1333_v40  ;;  %v248_v32 = vshll.u32 %v2037_v0, 30  ;;  %v419_v12 = vshll.u32 %v1588_v18, %v413_v54  ;;  %v422_v35 = vshll.u32 %v1589_v21, %v413_v54 }
  0x61   :  { %977 = vperm.xlu1 %1532, %v867_v8   ;;  %932 = vperm.xlu0 %1537, %v852_v39   ;;  %v368_v14 = vsub.s32 32, %v367_v7  ;;  %v369_v46 = vshll.u32 %v360_v15, %v367_v7  ;;  %v372_v59 = vsub.s32 4294967266, %v367_v7  ;;  %v382_v15 = vsub.s32 4, %v1957_v50 }
  0x62   :  { %v2047_v20 = vsub.s32 %v245_v56, %v248_v32  ;;  %v417_v44 = vshrl.u32 %v1588_v18, %v414_v33  ;;  %v420_v53 = vshrl.u32 %v1589_v21, %v414_v33  ;;  %v412_v56 = vshrl.u32 %v411_v19, 5 }
  0x63   :  { %v370_v17 = vshrl.u32 %v352_v47, %v368_v14  ;;  %v373_v2 = vadd.s32 127, %v372_v59  ;;  %v2058_v57 = vsel %vm298_vm0, %v382_v15, %v1957_v50  ;;  %v425_v48 = vshll.u32 %v1590_v23, %v413_v54 }
  0x64   :  { %v251_v58 = vsub.s32 0, %v2047_v20  ;;  %v2064_v39 = vpop.eup %1546  ;;  %v407_v7 = vor.u32 8388608, %v406_v29  ;;  %v426_v63 = vshrl.u32 %v1591_v25, %v414_v33  ;;  %v428_v14 = vshll.u32 %v1591_v25, %v413_v54  ;;  %v869_v25 = vld [vmem:[%s2500_s1 + $0xf0] sm:$0xff] }
  0x65   :  { %1013 = vperm.xlu1 %1532, %v879_v49   ;;  %1019 = vperm.xlu0 %1537, %v881_v52   ;;  %v371_v13 = vor.u32 %v370_v17, %v369_v46  ;;  %v374_v27 = vshll.u32 %v373_v2, 23  ;;  %v851_v49 = vld [vmem:[%s2500_s1 + $0x60] sm:$0xff]  ;;  %v423_v52 = vshrl.u32 %v1590_v23, %v414_v33  ;;  %v181_v18 = vxor.u32 2147483648, %v2064_v39  ;;  %v1549_v21 = vpop.eup %1548 }
  0x66   :  { %v1328_v50 = vmin.u32 %v251_v58, %v2047_v20  ;;  %v418_v59 = vor.u32 %v417_v44, %v416_v43  ;;  %v429_v19 = vshrl.u32 %v1592_v34, %v414_v33  ;;  %v427_v17 = vor.u32 %v426_v63, %v425_v48 }
  0x67   :  { %v375_v42 = vor.u32 4788187, %v374_v27  ;;  %v378_v8 = vcvt.s32.f32 %v371_v13  ;;  %v415_v2 = vshrl.u32 %v1587_v16, %v414_v33  ;;  %vm431_vm3 = vcmp.lt.s32.totalorder %v412_v56, 1  ;;  %v870_v16 = vld [vmem:[%s2500_s1 + $0xf8] sm:$0xff] }
  0x68   :  { %v253_v46 = vclz %v1328_v50  ;;  %vm434_vm4 = vcmp.lt.s32.totalorder %v412_v56, 4  ;;  %v430_v34 = vor.u32 %v429_v19, %v428_v14  ;;  %vm433_vm5 = vcmp.lt.s32.totalorder %v412_v56, 3 }
  0x69   :  { %1016 = vperm.xlu1 %1532, %v880_v26   ;;  %935 = vperm.xlu0 %1537, %v853_v45   ;;  %v376_v22 = vand.u32 2147483647, %v375_v42  ;;  %v421_v26 = vor.u32 %v420_v53, %v419_v12  ;;  %v424_v45 = vor.u32 %v423_v52, %v422_v35  ;;  %v178_v15 = vxor.u32 2147483648, %v1549_v21 }
  0x6a   :  { %v1329_v32 = vadd.s32 4294967294, %v253_v46  ;;  %vm432_vm6 = vcmp.lt.s32.totalorder %v412_v56, 2  ;;  %vm180_vm7 = vcmp.eq.s32.totalorder %v2052_v4, 2  ;;  %v440_v27 = vsel %vm434_vm4, %v427_v17, 920167782 }
  0x6b   :  { %v379_v40 = vmul.f32 %v378_v8, %v376_v22  ;;  %v436_v31 = vsel %vm434_vm4, %v424_v45, 2102212464  ;;  %v439_v13 = vsel %vm431_vm3, %v418_v59, %v421_v26  ;;  %v435_v33 = vsel %vm431_vm3, %v415_v2, %v418_v59 }
  0x6c   :  { %v437_v42 = vsel %vm433_vm5, %v421_v26, %v436_v31  ;;  %v441_v8 = vsel %vm433_vm5, %v424_v45, %v440_v27  ;;  %vm176_vm8 = vcmp.lt.s32.totalorder %v2052_v4, 2  ;;  %v444_v29 = vsel %vm434_vm4, %v430_v34, 1326507024 }
  0x6d   :  { %1535 = vset.pattern.permute.xlu1 %v1585_v6  ;;  %1028 = vperm.xlu0 %1537, %v884_v60   ;;  %v380_v47 = vxor.u32 2147483648, %v379_v40  ;;  %v447_v60 = vshll.u32 %v407_v7, 8  ;;  %v442_v22 = vsel %vm432_vm6, %v439_v13, %v441_v8  ;;  %v179_v30 = vsel %vm177_vm2, %v2064_v39, %v178_v15  ;;  %v854_v7 = vld [vmem:[%s2500_s1 + $0x78] sm:$0xff] }
  0x6e   :  { %776 = vperm.xlu1 %1535, %v1632_v5   ;;  %v385_v5 = vsel %vm2069_vm1, 0, %v2058_v57  ;;  %v443_v57 = vsel %vm431_vm3, %v421_v26, %v424_v45  ;;  %v182_v50 = vsel %vm180_vm7, %v181_v18, %v1549_v21  ;;  %vm1330_vm9 = vcmp.lt.s32.totalorder %v1329_v32, 0 }
  0x6f   :  { %v381_v23 = vsel %vm298_vm0, %v380_v47, %v379_v40  ;;  %v389_v58 = vand.u32 3, %v385_v5  ;;  %v445_v43 = vsel %vm433_vm5, %v427_v17, %v444_v29  ;;  %v438_v44 = vsel %vm432_vm6, %v435_v33, %v437_v42  ;;  %v882_v5 = vld [vmem:[%s2500_s1 + $0x158] sm:$0xff]  ;;  %v883_v33 = vld [vmem:[%s2500_s1 + $0x160] sm:$0xff] }
  0x70   :  { %v384_v54 = vsel %vm2069_vm1, %v1762_v10, %v381_v23  ;;  %v2125_v40 = vmul.u32.u64.low %v447_v60, %v442_v22  ;;  %v2126_v12 = vmul.u32.u64.high %v447_v60, %v442_v22, %v2125_v40  ;;  %v183_v39 = vsel %vm176_vm8, %v179_v30, %v182_v50 }
  0x71   :  { %1034 = vperm.xlu0 %1537, %v886_v62   ;;  %1550 = vcosq.f32 %v384_v54  ;;  %v446_v62 = vsel %vm432_vm6, %v443_v57, %v445_v43  ;;  %v256_v35 = vsel %vm1330_vm9, 0, %v1329_v32  ;;  %v454_v52 = vmul.u32 %v447_v60, %v438_v44 }
  0x72   :  { %1536 = vset.pattern.permute.xlu1 %v1584_v1  ;;  %1552 = vsinq.f32 %v384_v54  ;;  %vm394_vm11 = vcmp.eq.s32.totalorder %v389_v58, 2  ;;  %v457_v48 = vadd.s32 1, %v2126_v12  ;;  %vm391_vm13 = vcmp.eq.s32.totalorder %v389_v58, 0 }
  0x73   :  { %929 = vperm.xlu1 %1536, %v851_v49   ;;  %v2132_v53 = vmul.u32.u64.low %v447_v60, %v446_v62  ;;  %v2133_v49 = vmul.u32.u64.high %v447_v60, %v446_v62, %v2132_v53  ;;  %v184_v38 = vsel %vm174_vm10, nan, %v183_v39  ;;  %v261_v14 = vsub.s32 4294967266, %v256_v35 }
  0x74   :  { %vm390_vm15 = vcmp.lt.s32.totalorder %v389_v58, 2  ;;  %vm388_vm0 = vweird.f32 %v1762_v10  ;;  %v288_v23 = vmul.f32 0.5, %v184_v38  ;;  %v257_v54 = vsub.s32 32, %v256_v35 }
  0x75   :  { %vm456_vm14 = vc.u32 %v2133_v49, %v2125_v40  ;;  %v262_v2 = vadd.s32 127, %v261_v14  ;;  %vm522_vm1 = vcmp.lt.f32.partialorder %v1743_v51, 6.0  ;;  %v258_v27 = vshll.u32 %v2047_v20, %v256_v35 }
  0x76   :  { %v458_v18 = vsel %vm456_vm14, %v457_v48, %v2126_v12  ;;  %v290_v32 = vadd.f32 0.5, %v288_v23  ;;  %v1593_v42 = vmov 0.0   ;;  %v576_v22 = vlaneseq  ;;  %v1580_v48 = vld [vmem:[%s2499_s2 + $0x10] sm:$0x3] }
  0x77   :  { %983 = vperm.xlu1 %1536, %v869_v25   ;;  %v459_v21 = vadd.s32 %v458_v18, %v454_v52  ;;  %v241_v25 = vadd.s32 %v1962_v55, %v1996_v24  ;;  %v263_v55 = vshll.u32 %v262_v2, 23  ;;  %v1339_v8 = vsel %vm522_vm1, 1.0, %v1593_v42  ;;  %21 = vst [vmem:[%s2502_s3 + $0x10] sm:$0x3] %v1593_v42 }
  0x78   :  { %v516_v58 = vrot.slane %v290_v32, 7  ;;  %v530_v62 = vrot.slane %v1339_v8, 7  ;;  %v2176_v12 = vshrl.u32 %v576_v22, 7  ;;  %v455_v18 = vadd.s32 %v2125_v40, %v2133_v49 }
  0x79   :  { %v460_v45 = vadd.s32 536870912, %v459_v21  ;;  %v259_v60 = vshrl.u32 %v241_v25, %v257_v54  ;;  %v264_v30 = vor.u32 4788187, %v263_v55  ;;  %v2203_v2 = vand.u32 127, %v576_v22 }
  0x7a   :  { %vm187_vm3 = vcmp.lt.s32.totalorder %v1672_v36, 0  ;;  %v1594_v8 = vmov 1.0|1.0   ;;  %vm401_vm14 = vcmp.lt.s32.totalorder %v1982_v28, 0 }
  0x7b   :  { %986 = vperm.xlu1 %1536, %v870_v16   ;;  %v1551_v56 = vpop.eup %1550  ;;  %v2157_v15 = vshrl.u32 %v460_v45, 30  ;;  %v260_v29 = vor.u32 %v259_v60, %v258_v27  ;;  %v265_v35 = vand.u32 2147483647, %v264_v30  ;;  %v2508_v27 = vand.u32 2147483647, %v1672_v36 }
  0x7c   :  { %v1553_v47 = vpop.eup %1552  ;;  %v395_v63 = vxor.u32 2147483648, %v1551_v56 }
  0x7d   :  { %v392_v4 = vxor.u32 2147483648, %v1553_v47  ;;  %v462_v24 = vshll.u32 %v2157_v15, 30  ;;  %v267_v52 = vcvt.s32.f32 %v260_v29  ;;  %vm2216_vm6 = vcmp.le.f32.partialorder %v2508_v27, 0.7853982 }
  0x7e   :  { %v396_v19 = vsel %vm394_vm11, %v395_v63, %v1553_v47  ;;  %v2189_v63 = vsub.s32 0, %v2176_v12 }
  0x7f   :  { %1022 = vperm.xlu1 %1536, %v882_v5   ;;  %v393_v26 = vsel %vm391_vm13, %v1551_v56, %v392_v4  ;;  %v463_v57 = vsub.s32 %v459_v21, %v462_v24  ;;  %v268_v14 = vmul.f32 %v267_v52, %v265_v35 }
  0x80   :  { %v397_v17 = vsel %vm390_vm15, %v393_v26, %v396_v19  ;;  %vm2245_vm15 = vcmp.le.f32.partialorder %v399_v41, 0.7853982 }
  0x81   :  { %v2148_v59 = vpop.permute.xlu0 %632  ;;  %v398_v31 = vsel %vm388_vm0, nan, %v397_v17  ;;  %v465_v50 = vsub.s32 0, %v463_v57  ;;  %v269_v25 = vxor.u32 2147483648, %v268_v14 }
  0x82   :  { %v2146_v46 = vpop.permute.xlu1 %893  ;;  %v502_v13 = vmul.f32 0.5, %v398_v31 }
  0x83   :  { %938 = vperm.xlu1 %1536, %v854_v7   ;;  %v1336_v5 = vmin.u32 %v465_v50, %v463_v57  ;;  %v270_v55 = vsel %vm187_vm3, %v269_v25, %v268_v14  ;;  %vm1036_vm8 = vcmp.eq.s32.totalorder %v2203_v2, %v2146_v46  ;;  %v651_v50 = vsub.s32 6, %v2176_v12 }
  0x85   :  { %v467_v56 = vclz %v1336_v5 }
  0x86   :  { %v2155_v34 = vpop.permute.xlu1 %896  ;;  %v2160_v10 = vpop.permute.xlu0 %772 }
  0x87   :  { %1538 = vset.pattern.permute.xlu1 %v1586_v9  ;;  %v504_v9 = vadd.f32 0.5, %v502_v13  ;;  %v1337_v38 = vadd.s32 4294967294, %v467_v56  ;;  %vm1037_vm5 = vcmp.eq.s32.totalorder %v2203_v2, %v2155_v34 }
  0x88   :  { %757 = vperm.xlu1 %1538, %v749_v11   ;;  %v579_v11 = vrot.slane %v1702_v61, %v2189_v63  ;;  %vm1391_vm10 = vmpackc.low %vm1037_vm5, %vm1036_vm8 }
  0x89   :  { %v508_v20 = vrot.slane %v504_v9, 7  ;;  %vm1338_vm2 = vcmp.lt.s32.totalorder %v1337_v38, 0 }
  0x8a   :  { %v2165_v16 = vpop.permute.xlu1 %950  ;;  %v470_v21 = vsel %vm1338_vm2, 0, %v1337_v38  ;;  %v2209_v40 = vrot.slane %v579_v11, %v2189_v63 }
  0x8b   :  { %v2172_v51 = vpop.permute.xlu0 %730  ;;  %v512_v44 = vmul.f32 %v508_v20, %v290_v32  ;;  %v471_v23 = vsub.s32 32, %v470_v21  ;;  %v472_v26 = vshll.u32 %v463_v57, %v470_v21  ;;  %v475_v45 = vsub.s32 4294967266, %v470_v21 }
  0x8c   :  { %1539 = vset.pattern.permute.xlu1 %v1584_v1  ;;  %v273_v57 = vsel %vm2216_vm6, %v1672_v36, %v270_v55  ;;  %vm1055_vm11 = vcmp.eq.s32.totalorder %v2203_v2, %v2165_v16  ;;  %v647_v16 = vsub.s32 2, %v2176_v12 }
  0x8d   :  { %1025 = vperm.xlu1 %1539, %v883_v33   ;;  %v520_v39 = vmul.f32 %v516_v58, %v512_v44  ;;  %v473_v54 = vshrl.u32 %v455_v18, %v471_v23  ;;  %1554 = vcosq.f32 %v273_v57 }
  0x8e   :  { %v2174_v43 = vpop.permute.xlu1 %902  ;;  %1556 = vsinq.f32 %v273_v57 }
  0x8f   :  { %v2178_v53 = vpop.permute.xlu0 %754  ;;  %v2186_v7 = vmul.f32 %v530_v62, %v520_v39  ;;  %v474_v49 = vor.u32 %v473_v54, %v472_v26  ;;  %v271_v62 = vsub.s32 4, %v2037_v0  ;;  %vm1039_vm0 = vcmp.eq.s32.totalorder %v2203_v2, %v2174_v43  ;;  %v2267_v43 = vld [vmem:[%s2501_s0] sm:$0x77] }
  0x90   :  { %v485_v39 = vsub.s32 4, %v2157_v15  ;;  %v648_v52 = vrot.slane %v2267_v43, %v647_v16  ;;  %v652_v56 = vrot.slane %v2267_v43, %v651_v50 }
  0x91   :  { %1540 = vset.pattern.permute.xlu1 %v1585_v6  ;;  %v885_v6 = vld [vmem:[%s2500_s1 + $0x170] sm:$0xff]  ;;  %v481_v9 = vcvt.s32.f32 %v474_v49  ;;  %v272_v38 = vsel %vm187_vm3, %v271_v62, %v2037_v0 }
  0x92   :  { %780 = vperm.xlu1 %1540, %v1580_v48   ;;  %v2184_v47 = vpop.permute.xlu1 %956  ;;  %v486_v21 = vsel %vm401_vm14, %v485_v39, %v2157_v15  ;;  %v274_v0 = vsel %vm2216_vm6, 0, %v272_v38  ;;  %v2291_v23 = vrot.slane %v648_v52, %v647_v16 }
  0x93   :  { %v2191_v4 = vpop.permute.xlu0 %733  ;;  %v278_v54 = vand.u32 3, %v274_v0 }
  0x96   :  { %1541 = vset.pattern.permute.xlu1 %v1584_v1  ;;  %v2199_v19 = vpop.permute.xlu1 %992  ;;  %v476_v1 = vadd.s32 127, %v475_v45 }
  0x97   :  { %1031 = vperm.xlu1 %1541, %v885_v6   ;;  %v2277_v6 = vld [vmem:[%s2501_s0 + $0x8] sm:$0x7]  ;;  %v1555_v11 = vpop.eup %1554 }
  0x98   :  { %v942_v17 = vpop.permute.xlu0 %941  ;;  %v477_v32 = vshll.u32 %v476_v1, 23  ;;  %v656_v14 = vrot.slane %v2277_v6, %v647_v16  ;;  %v1557_v45 = vpop.eup %1556  ;;  %v284_v60 = vxor.u32 2147483648, %v1555_v11 }
  0x99   :  { %vm1052_vm4 = vcmp.eq.s32.totalorder %v2203_v2, %v942_v17  ;;  %v2295_v17 = vrot.slane %v652_v56, %v647_v16 }
  0x9a   :  { %v2205_v31 = vpop.permute.xlu1 %908  ;;  %v478_v33 = vor.u32 4788187, %v477_v32  ;;  %v2297_v25 = vrot.slane %v656_v14, %v647_v16 }
  0x9b   :  { %vm1041_vm6 = vcmp.eq.s32.totalorder %v2203_v2, %v2205_v31 }
  0x9c   :  { %v945_v13 = vpop.permute.xlu0 %944  ;;  %v479_v20 = vand.u32 2147483647, %v478_v33 }
  0x9d   :  { %vm1053_vm7 = vcmp.eq.s32.totalorder %v2203_v2, %v945_v13 }
  0x9e   :  { %v2223_v24 = vpop.permute.xlu1 %566  ;;  %vm1407_vm9 = vmpackc.low %vm1053_vm7, %vm1052_vm4  ;;  %v482_v22 = vmul.f32 %v481_v9, %v479_v20  ;;  %vm1057_vm4 = vcmp.eq.s32.totalorder %v2203_v2, %v2184_v47  ;;  %v488_v47 = vsel %vm2245_vm15, 0, %v486_v21  ;;  %vm1069_vm7 = vcmp.eq.s32.totalorder %v2203_v2, %v2199_v19 }
  0x9f   :  { %v2229_v34 = vmul.f32 %v2209_v40, %v2223_v24  ;;  %1439 = vmatprep.subr.msk.bf16.mxu0 %vm1407_vm9, %v1594_v8  ;;  %v492_v13 = vand.u32 3, %v488_v47  ;;  %v281_v19 = vxor.u32 2147483648, %v1557_v45 }
  0xa0   :  { %v948_v58 = vpop.permute.xlu0 %947  ;;  %1440 = vmatpush3.bf16.msk.msra.mxu0 %vm1391_vm10, %v1594_v8  ;;  %v483_v30 = vxor.u32 2147483648, %v482_v22  ;;  %vm277_vm10 = vweird.f32 %v1672_v36 }
  0xa1   :  { %vm1054_vm12 = vcmp.eq.s32.totalorder %v2203_v2, %v948_v58 }
  0xa2   :  { %v2239_v46 = vpop.permute.xlu1 %962  ;;  %vm1409_vm13 = vmpackc.low %vm1055_vm11, %vm1054_vm12  ;;  %v484_v41 = vsel %vm401_vm14, %v483_v30, %v482_v22  ;;  %vm491_vm11 = vweird.f32 %v1982_v28 }
  0xa3   :  { %1441 = vmatprep.subr.msk.bf16.mxu0 %vm1409_vm13, %v1594_v8  ;;  %v487_v35 = vsel %vm2245_vm15, %v1982_v28, %v484_v41  ;;  %vm736_vm13 = vcmp.eq.s32.totalorder %v2172_v51, 1  ;;  %vm279_vm15 = vcmp.lt.s32.totalorder %v278_v54, 2 }
  0xa4   :  { %v900_v44 = vpop.permute.xlu0 %899  ;;  %1558 = vcosq.f32 %v487_v35 }
  0xa5   :  { %vm1038_vm1 = vcmp.eq.s32.totalorder %v2203_v2, %v900_v44  ;;  %1560 = vsinq.f32 %v487_v35 }
  0xa6   :  { %v2255_v5 = vpop.permute.xlu1 %998  ;;  %vm1393_vm2 = vmpackc.low %vm1039_vm0, %vm1038_vm1  ;;  %vm280_vm0 = vcmp.eq.s32.totalorder %v278_v54, 0  ;;  %vm283_vm1 = vcmp.eq.s32.totalorder %v278_v54, 2 }
  0xa7   :  { %1442 = vmatpush3.bf16.msk.msra.mxu0 %vm1393_vm2, %v1594_v8  ;;  %vm493_vm2 = vcmp.lt.s32.totalorder %v492_v13, 2  ;;  %v282_v62 = vsel %vm280_vm0, %v1555_v11, %v281_v19  ;;  %v285_v41 = vsel %vm283_vm1, %v284_v60, %v1557_v45 }
  0xa8   :  { %v954_v48 = vpop.permute.xlu0 %953 }
  0xa9   :  { %vm1056_vm5 = vcmp.eq.s32.totalorder %v2203_v2, %v954_v48 }
  0xaa   :  { %v2283_v18 = vpop.permute.xlu1 %914  ;;  %vm1411_vm3 = vmpackc.low %vm1057_vm4, %vm1056_vm5  ;;  %vm494_vm4 = vcmp.eq.s32.totalorder %v492_v13, 0  ;;  %vm497_vm5 = vcmp.eq.s32.totalorder %v492_v13, 2 }
  0xab   :  { %1443 = vmatprep.subr.msk.bf16.mxu0 %vm1411_vm3, %v1594_v8  ;;  %vm760_vm3 = vcmp.eq.s32.totalorder %v2178_v53, 1 }
  0xac   :  { %v990_v26 = vpop.permute.xlu0 %989 }
  0xad   :  { %vm1068_vm8 = vcmp.eq.s32.totalorder %v2203_v2, %v990_v26 }
  0xae   :  { %vm1423_vm9 = vmpackc.low %vm1069_vm7, %vm1068_vm8  ;;  %v1559_v55 = vpop.eup %1558  ;;  %vm1059_vm7 = vcmp.eq.s32.totalorder %v2203_v2, %v2239_v46 }
  0xaf   :  { %v638_v15 = vpop.permute.xlu1 %637  ;;  %1477 = vmatprep.subr.msk.bf16.mxu1 %vm1423_vm9, %v1594_v8  ;;  %v1561_v20 = vpop.eup %1560  ;;  %v498_v22 = vxor.u32 2147483648, %v1559_v55 }
  0xb0   :  { %v675_v1 = vmul.f32 %v2291_v23, %v638_v15  ;;  %v676_v49 = vmul.f32 %v2295_v17, %v638_v15  ;;  %v677_v32 = vmul.f32 %v2297_v25, %v638_v15  ;;  %v906_v27 = vpop.permute.xlu0 %905  ;;  %1478 = vmatpush3.bf16.msk.msra.mxu1 %vm1423_vm9, %v1594_v8  ;;  %v495_v50 = vxor.u32 2147483648, %v1561_v20 }
  0xb1   :  { %vm1040_vm12 = vcmp.eq.s32.totalorder %v2203_v2, %v906_v27  ;;  %v499_v0 = vsel %vm497_vm5, %v498_v22, %v1561_v20  ;;  %v286_v15 = vsel %vm279_vm15, %v282_v62, %v285_v41  ;;  %v672_v62 = vmul.f32 %v2291_v23, %v2148_v59 }
  0xb2   :  { %v684_v33 = vadd.f32 1.0, %v675_v1  ;;  %v685_v9 = vadd.f32 1.0, %v676_v49  ;;  %v686_v57 = vadd.f32 1.0, %v677_v32  ;;  %vm1395_vm14 = vmpackc.low %vm1041_vm6, %vm1040_vm12  ;;  %v496_v21 = vsel %vm494_vm4, %v1559_v55, %v495_v50 }
  0xb3   :  { %1444 = vmatpush3.bf16.msk.msra.mxu0 %vm1395_vm14, %v1594_v8  ;;  %v500_v51 = vsel %vm493_vm2, %v496_v21, %v499_v0  ;;  %v287_v32 = vsel %vm277_vm10, nan, %v286_v15  ;;  %vm1071_vm6 = vcmp.eq.s32.totalorder %v2203_v2, %v2255_v5  ;;  %v582_v5 = vsub.s32 4, %v2176_v12 }
  0xb4   :  { %v702_v31 = vmul.f32 %v684_v33, %v684_v33  ;;  %v2314_v58 = vpop.permute.xlu1 %965  ;;  %v703_v29 = vmul.f32 %v685_v9, %v685_v9  ;;  %v704_v30 = vmul.f32 %v686_v57, %v686_v57  ;;  %v2316_v16 = vpop.permute.xlu0 %561  ;;  %v693_v39 = vand.u32 2147483647, %v684_v33 }
  0xb5   :  { %v694_v35 = vand.u32 2147483647, %v685_v9  ;;  %v695_v48 = vand.u32 2147483647, %v686_v57  ;;  %v501_v46 = vsel %vm491_vm11, nan, %v500_v51  ;;  %v289_v53 = vmul.f32 0.5, %v287_v32 }
  0xb6   :  { %v711_v44 = vmul.f32 %v702_v31, %v702_v31  ;;  %v712_v52 = vmul.f32 %v703_v29, %v703_v29  ;;  %v713_v56 = vmul.f32 %v704_v30, %v704_v30  ;;  %v503_v19 = vmul.f32 0.5, %v501_v46 }
  0xb7   :  { %vm1043_vm11 = vcmp.eq.s32.totalorder %v2203_v2, %v2283_v18  ;;  %v291_v60 = vadd.f32 0.5, %v289_v53  ;;  %vm523_vm2 = vcmp.lt.f32.partialorder %v1936_v37, 6.0  ;;  %vm1060_vm4 = vcmp.eq.s32.totalorder %v2203_v2, %v2314_v58 }
  0xb8   :  { %v1002_v38 = vpop.permute.xlu1 %1001  ;;  %v741_v14 = vsel %vm736_vm13, %v702_v31, %v711_v44  ;;  %v960_v26 = vpop.permute.xlu0 %959  ;;  %v742_v47 = vsel %vm736_vm13, %v703_v29, %v712_v52  ;;  %v743_v11 = vsel %vm736_vm13, %v704_v30, %v713_v56  ;;  %v505_v13 = vadd.f32 0.5, %v503_v19 }
  0xb9   :  { %v2328_v45 = vsel %vm760_vm3, %v693_v39, %v741_v14  ;;  %vm1058_vm8 = vcmp.eq.s32.totalorder %v2203_v2, %v960_v26  ;;  %v2336_v1 = vsel %vm760_vm3, %v694_v35, %v742_v47  ;;  %v2340_v49 = vsel %vm760_vm3, %v695_v48, %v743_v11 }
  0xba   :  { %vm1413_vm9 = vmpackc.low %vm1059_vm7, %vm1058_vm8  ;;  %vm1072_vm15 = vcmp.eq.s32.totalorder %v2203_v2, %v1002_v38  ;;  %v509_v55 = vrot.slane %v505_v13, 7  ;;  %v583_v18 = vrot.slane %v1702_v61, %v582_v5  ;;  %v517_v20 = vrot.slane %v291_v60, 7 }
  0xbb   :  { %1445 = vmatprep.subr.msk.bf16.mxu0 %vm1413_vm9, %v1594_v8  ;;  %v587_v31 = vrot.slane %v1707_v3, %v2189_v63  ;;  %vm536_vm7 = vcmp.lt.f32.partialorder %v2267_v43, 6.0  ;;  %v1340_v37 = vsel %vm523_vm2, 1.0, %v1593_v42  ;;  %vm537_vm8 = vcmp.lt.f32.partialorder %v2277_v6, 6.0 }
  0xbc   :  { %v1005_v54 = vpop.permute.xlu1 %1004  ;;  %v996_v27 = vpop.permute.xlu0 %995  ;;  %v513_v57 = vmul.f32 %v509_v55, %v291_v60  ;;  %v2376_v61 = vrot.slane %v583_v18, %v2189_v63  ;;  %v1341_v3 = vsel %vm536_vm7, 1.0, %v1593_v42  ;;  %v531_v30 = vrot.slane %v1340_v37, 7 }
  0xbd   :  { %vm1073_vm12 = vcmp.eq.s32.totalorder %v2203_v2, %v1005_v54  ;;  %vm1070_vm13 = vcmp.eq.s32.totalorder %v2203_v2, %v996_v27  ;;  %v2380_v50 = vrot.slane %v587_v31, %v2189_v63  ;;  %v603_v43 = vmul.f32 %v2209_v40, %v2316_v16 }
  0xbe   :  { %vm1425_vm14 = vmpackc.low %vm1071_vm6, %vm1070_vm13  ;;  %v521_v58 = vmul.f32 %v517_v20, %v513_v57  ;;  %v1342_v44 = vsel %vm537_vm8, 1.0, %v1593_v42  ;;  %v673_v41 = vmul.f32 %v2295_v17, %v2148_v59  ;;  %v674_v39 = vmul.f32 %v2297_v25, %v2148_v59 }
  0xbf   :  { %1479 = vmatprep.subr.msk.bf16.mxu1 %vm1425_vm14, %v1594_v8  ;;  %vm1427_vm10 = vmpackc.low %vm1073_vm12, %vm1072_vm15  ;;  %v604_v63 = vmul.f32 %v2376_v61, %v2316_v16  ;;  %v605_v52 = vmul.f32 %v2380_v50, %v2316_v16  ;;  %v544_v56 = vrot.slane %v1341_v3, 7  ;;  %v545_v38 = vrot.slane %v1342_v44, 7 }
  0xc0   :  { %v921_v36 = vpop.permute.xlu1 %920  ;;  %v912_v28 = vpop.permute.xlu0 %911  ;;  %1480 = vmatpush3.bf16.msk.msra.mxu1 %vm1425_vm14, %v1594_v8  ;;  %v535_v48 = vmul.f32 %v531_v30, %v521_v58  ;;  %v612_v14 = vmul.f32 1.442695, %v603_v43  ;;  %v681_v21 = vadd.f32 1.0, %v672_v62  ;;  %v682_v0 = vadd.f32 1.0, %v673_v41 }
  0xc1   :  { %vm1042_vm0 = vcmp.eq.s32.totalorder %v2203_v2, %v912_v28  ;;  %1481 = vmatprep.subr.msk.bf16.mxu1 %vm1427_vm10, %v1594_v8  ;;  %vm1045_vm9 = vcmp.eq.s32.totalorder %v2203_v2, %v921_v36  ;;  %v683_v26 = vadd.f32 1.0, %v674_v39  ;;  %v614_v47 = vmul.f32 1.442695, %v604_v63 }
  0xc2   :  { %vm1397_vm1 = vmpackc.low %vm1043_vm11, %vm1042_vm0  ;;  %v616_v51 = vmul.f32 1.442695, %v605_v52  ;;  %v548_v59 = vmul.f32 %v544_v56, %v2186_v7  ;;  %v549_v54 = vmul.f32 %v545_v38, %v535_v48  ;;  %1562 = vpow2.f32 %v612_v14 }
  0xc3   :  { %1446 = vmatpush3.bf16.msk.msra.mxu0 %vm1397_vm1, %v1594_v8  ;;  %v805_v16 = vsub.s32 1, %v2176_v12  ;;  %v809_v32 = vsub.s32 5, %v2176_v12  ;;  %v699_v46 = vmul.f32 %v681_v21, %v681_v21  ;;  %v700_v27 = vmul.f32 %v682_v0, %v682_v0 }
  0xc4   :  { %v972_v33 = vpop.permute.xlu1 %971  ;;  %v969_v9 = vpop.permute.xlu0 %968  ;;  %1482 = vmatpush3.bf16.msk.msra.mxu1 %vm1427_vm10, %v1594_v8  ;;  %v701_v19 = vmul.f32 %v683_v26, %v683_v26  ;;  %1564 = vpow2.f32 %v614_v47  ;;  %v550_v13 = vmul.f32 %v1341_v3, %v548_v59  ;;  %v551_v36 = vmul.f32 %v1342_v44, %v549_v54 }
  0xc5   :  { %vm1061_vm5 = vcmp.eq.s32.totalorder %v2203_v2, %v969_v9  ;;  %vm1062_vm13 = vcmp.eq.s32.totalorder %v2203_v2, %v972_v33  ;;  %1566 = vpow2.f32 %v616_v51  ;;  %v690_v28 = vand.u32 2147483647, %v681_v21 }
  0xc6   :  { %vm1415_vm3 = vmpackc.low %vm1061_vm5, %vm1060_vm4  ;;  %v708_v5 = vmul.f32 %v699_v46, %v699_v46  ;;  %v709_v12 = vmul.f32 %v700_v27, %v700_v27  ;;  %v710_v60 = vmul.f32 %v701_v19, %v701_v19  ;;  %v810_v33 = vrot.slane %v550_v13, %v809_v32 }
  0xc7   :  { %1447 = vmatprep.subr.msk.bf16.mxu0 %vm1415_vm3, %v1594_v8  ;;  %v806_v9 = vrot.slane %v550_v13, %v805_v16  ;;  %v691_v18 = vand.u32 2147483647, %v682_v0  ;;  %v692_v57 = vand.u32 2147483647, %v683_v26  ;;  %v607_v20 = vmul.f32 %v2376_v61, %v2223_v24 }
  0xc8   :  { %v1008_v22 = vpop.permute.xlu1 %1007  ;;  %v918_v29 = vpop.permute.xlu0 %917  ;;  %v608_v58 = vmul.f32 %v2380_v50, %v2223_v24  ;;  %v2419_v63 = vrot.slane %v810_v33, %v805_v16  ;;  %v618_v48 = vmul.f32 1.442695, %v2229_v34 }
  0xc9   :  { %vm1044_vm6 = vcmp.eq.s32.totalorder %v2203_v2, %v918_v29  ;;  %vm1074_vm10 = vcmp.eq.s32.totalorder %v2203_v2, %v1008_v22  ;;  %v814_v22 = vrot.slane %v551_v36, %v805_v16  ;;  %v2421_v52 = vrot.slane %v806_v9, %v805_v16 }
  0xca   :  { %vm1399_vm12 = vmpackc.low %vm1045_vm9, %vm1044_vm6  ;;  %v620_v21 = vmul.f32 1.442695, %v607_v20  ;;  %1568 = vpow2.f32 %v618_v48 }
  0xcb   :  { %1448 = vmatpush3.bf16.msk.msra.mxu0 %vm1399_vm12, %v1594_v8  ;;  %v2425_v14 = vrot.slane %v814_v22, %v805_v16 }
  0xcc   :  { %v924_v6 = vpop.permute.xlu1 %923  ;;  %v2394_v35 = vpop.permute.xlu0 %571  ;;  %1570 = vpow2.f32 %v620_v21 }
  0xcd   :  { %vm1046_vm2 = vcmp.eq.s32.totalorder %v2203_v2, %v924_v6  ;;  %v1563_v44 = vpop.eup %1562  ;;  %v609_v22 = vmul.f32 %v2209_v40, %v2394_v35  ;;  %v611_v40 = vmul.f32 %v2380_v50, %v2394_v35 }
  0xce   :  { %v1565_v56 = vpop.eup %1564 }
  0xcf   :  { %v1567_v24 = vpop.eup %1566 }
  0xd0   :  { %v975_v11 = vpop.permute.xlu0 %974 }
  0xd1   :  { %v728_v15 = vpop.permute.xlu1 %727  ;;  %vm1063_vm14 = vcmp.eq.s32.totalorder %v2203_v2, %v975_v11  ;;  %v622_v11 = vmul.f32 1.442695, %v608_v58 }
  0xd2   :  { %vm1417_vm15 = vmpackc.low %vm1063_vm14, %vm1062_vm13  ;;  %vm735_vm1 = vcmp.eq.s32.totalorder %v728_v15, 1 }
  0xd3   :  { %1449 = vmatprep.subr.msk.bf16.mxu0 %vm1417_vm15, %v1594_v8  ;;  %v738_v37 = vsel %vm735_vm1, %v699_v46, %v708_v5  ;;  %v739_v29 = vsel %vm735_vm1, %v700_v27, %v709_v12  ;;  %v740_v3 = vsel %vm735_vm1, %v701_v19, %v710_v60  ;;  %1572 = vpow2.f32 %v622_v11 }
  0xd4   :  { %v1011_v53 = vpop.permute.xlu0 %1010  ;;  %v1569_v16 = vpop.eup %1568 }
  0xd5   :  { %vm1075_vm11 = vcmp.eq.s32.totalorder %v2203_v2, %v1011_v53 }
  0xd6   :  { %v2406_v7 = vpop.permute.xlu1 %642  ;;  %vm1429_vm0 = vmpackc.low %vm1075_vm11, %vm1074_vm10  ;;  %v1571_v46 = vpop.eup %1570 }
  0xd7   :  { %1483 = vmatprep.subr.msk.bf16.mxu1 %vm1429_vm0, %v1594_v8  ;;  %v680_v58 = vmul.f32 %v2297_v25, %v2406_v7  ;;  %v628_v25 = vmul.f32 1.442695, %v611_v40 }
  0xd8   :  { %v927_v55 = vpop.permute.xlu0 %926  ;;  %1484 = vmatpush3.bf16.msk.msra.mxu1 %vm1429_vm0, %v1594_v8 }
  0xd9   :  { %vm1047_vm4 = vcmp.eq.s32.totalorder %v2203_v2, %v927_v55 }
  0xda   :  { %vm1401_vm5 = vmpackc.low %vm1047_vm4, %vm1046_vm2 }
  0xdb   :  { %v752_v31 = vpop.permute.xlu1 %751  ;;  %1450 = vmatpush3.bf16.msk.msra.mxu0 %vm1401_vm5, %v1594_v8 }
  0xdc   :  { %vm759_vm3 = vcmp.eq.s32.totalorder %v752_v31, 1  ;;  %v981_v39 = vpop.permute.xlu0 %980 }
  0xdd   :  { %v762_v30 = vsel %vm759_vm3, %v690_v28, %v738_v37  ;;  %v763_v43 = vsel %vm759_vm3, %v691_v18, %v739_v29  ;;  %v764_v6 = vsel %vm759_vm3, %v692_v57, %v740_v3  ;;  %vm1065_vm7 = vcmp.eq.s32.totalorder %v2203_v2, %v981_v39  ;;  %v1573_v13 = vpop.eup %1572 }
  0xde   :  { %v783_v62 = vmul.f32 %v2160_v10, %v762_v30  ;;  %v784_v41 = vmul.f32 %v2160_v10, %v763_v43  ;;  %v785_v38 = vmul.f32 %v2160_v10, %v764_v6  ;;  %v610_v37 = vmul.f32 %v2376_v61, %v2394_v35 }
  0xdf   :  { %v678_v29 = vmul.f32 %v2291_v23, %v2406_v7  ;;  %v679_v3 = vmul.f32 %v2295_v17, %v2406_v7  ;;  %v624_v61 = vmul.f32 1.442695, %v609_v22 }
  0xe0   :  { %v792_v0 = vmul.f32 %v1563_v44, %v783_v62  ;;  %v978_v26 = vpop.permute.xlu1 %977  ;;  %v793_v47 = vmul.f32 %v1565_v56, %v784_v41  ;;  %v794_v15 = vmul.f32 %v1567_v24, %v785_v38  ;;  %v933_v36 = vpop.permute.xlu0 %932  ;;  %v626_v23 = vmul.f32 1.442695, %v610_v37 }
  0xe1   :  { %vm1064_vm8 = vcmp.eq.s32.totalorder %v2203_v2, %v978_v26  ;;  %vm1049_vm14 = vcmp.eq.s32.totalorder %v2203_v2, %v933_v36  ;;  %v687_v17 = vadd.f32 1.0, %v678_v29  ;;  %v688_v6 = vadd.f32 1.0, %v679_v3 }
  0xe2   :  { %vm1419_vm9 = vmpackc.low %vm1065_vm7, %vm1064_vm8  ;;  %v831_v51 = vmul.f32 %v2419_v63, %v793_v47  ;;  %v2431_v34 = vmul.f32 %v2421_v52, %v792_v0  ;;  %v832_v10 = vmul.f32 %v2425_v14, %v794_v15  ;;  %v689_v44 = vadd.f32 1.0, %v680_v58 }
  0xe3   :  { %1451 = vmatprep.subr.msk.bf16.mxu0 %vm1419_vm9, %v1594_v8  ;;  %1574 = vpow2.f32 %v624_v61  ;;  %v705_v35 = vmul.f32 %v687_v17, %v687_v17  ;;  %v706_v7 = vmul.f32 %v688_v6, %v688_v6  ;;  %v696_v24 = vand.u32 2147483647, %v687_v17 }
  0xe4   :  { %v1014_v59 = vpop.permute.xlu1 %1013  ;;  %v1020_v57 = vpop.permute.xlu0 %1019  ;;  %1576 = vpow2.f32 %v626_v23  ;;  %v707_v62 = vmul.f32 %v689_v44, %v689_v44  ;;  %v697_v21 = vand.u32 2147483647, %v688_v6  ;;  %v698_v0 = vand.u32 2147483647, %v689_v44 }
  0xe5   :  { %vm1076_vm6 = vcmp.eq.s32.totalorder %v2203_v2, %v1014_v59  ;;  %vm1078_vm2 = vcmp.eq.s32.totalorder %v2203_v2, %v1020_v57  ;;  %1578 = vpow2.f32 %v628_v25  ;;  %v714_v39 = vmul.f32 %v705_v35, %v705_v35 }
  0xe6   :  { %v715_v56 = vmul.f32 %v706_v7, %v706_v7  ;;  %v716_v48 = vmul.f32 %v707_v62, %v707_v62 }
  0xe8   :  { %v1017_v54 = vpop.permute.xlu1 %1016  ;;  %v936_v30 = vpop.permute.xlu0 %935 }
  0xe9   :  { %vm1077_vm12 = vcmp.eq.s32.totalorder %v2203_v2, %v1017_v54  ;;  %vm1050_vm3 = vcmp.eq.s32.totalorder %v2203_v2, %v936_v30 }
  0xea   :  { %vm1431_vm13 = vmpackc.low %vm1077_vm12, %vm1076_vm6  ;;  %vm737_vm12 = vcmp.eq.s32.totalorder %v2191_v4, 1 }
  0xeb   :  { %1485 = vmatprep.subr.msk.bf16.mxu1 %vm1431_vm13, %v1594_v8  ;;  %v744_v26 = vsel %vm737_vm12, %v705_v35, %v714_v39  ;;  %v745_v47 = vsel %vm737_vm12, %v706_v7, %v715_v56  ;;  %v746_v11 = vsel %vm737_vm12, %v707_v62, %v716_v48 }
  0xec   :  { %1486 = vmatpush3.bf16.msk.msra.mxu1 %vm1431_vm13, %v1594_v8  ;;  %v1029_v41 = vpop.permute.xlu0 %1028 }
  0xed   :  { %v777_v32 = vpop.permute.xlu1 %776  ;;  %vm1081_vm9 = vcmp.eq.s32.totalorder %v2203_v2, %v1029_v41  ;;  %v1575_v15 = vpop.eup %1574 }
  0xee   :  { %v786_v27 = vmul.f32 %v777_v32, %v2328_v45  ;;  %v787_v19 = vmul.f32 %v777_v32, %v2336_v1  ;;  %v788_v53 = vmul.f32 %v777_v32, %v2340_v49  ;;  %v1577_v54 = vpop.eup %1576 }
  0xf0   :  { %v795_v28 = vmul.f32 %v1569_v16, %v786_v27  ;;  %v796_v5 = vmul.f32 %v1571_v46, %v787_v19  ;;  %v797_v12 = vmul.f32 %v1573_v13, %v788_v53  ;;  %v1579_v46 = vpop.eup %1578  ;;  %v1035_v27 = vpop.permute.xlu0 %1034 }
  0xf2   :  { %v930_v60 = vpop.permute.xlu1 %929  ;;  %v834_v55 = vmul.f32 %v2419_v63, %v796_v5  ;;  %v835_v33 = vmul.f32 %v2425_v14, %v797_v12  ;;  %v833_v9 = vmul.f32 %v2421_v52, %v795_v28 }
  0xf3   :  { %vm1048_vm15 = vcmp.eq.s32.totalorder %v2203_v2, %v930_v60 }
  0xf4   :  { %vm1403_vm10 = vmpackc.low %vm1049_vm14, %vm1048_vm15  ;;  %v1208_v45 = vpack.c.bf16 %v834_v55, %v831_v51  ;;  %v1209_v1 = vpack.c.bf16 %v835_v33, %v832_v10  ;;  %v1207_v49 = vpack.c.bf16 %v833_v9, %v2431_v34  ;;  %vm1083_vm15 = vcmp.eq.s32.totalorder %v2203_v2, %v1035_v27 }
  0xf5   :  { %1452 = vmatpush3.bf16.msk.msra.mxu0 %vm1403_vm10, %v1594_v8 }
  0xf6   :  { %v984_v18 = vpop.permute.xlu1 %983  ;;  %1245 = vmatprep.mubr.bf16.mxu0 %v1208_v45  ;;  %1493 = vmatprep.mubr.bf16.mxu1 %v1209_v1 }
  0xf7   :  { %vm1066_vm11 = vcmp.eq.s32.totalorder %v2203_v2, %v984_v18 }
  0xfa   :  { %v987_v20 = vpop.permute.xlu1 %986 }
  0xfb   :  { %vm1067_vm0 = vcmp.eq.s32.totalorder %v2203_v2, %v987_v20 }
  0xfc   :  { %vm1421_vm1 = vmpackc.low %vm1067_vm0, %vm1066_vm11 }
  0xfd   :  { %1453 = vmatprep.subr.msk.bf16.mxu0 %vm1421_vm1, %v1594_v8 }
  0xfe   :  { %v1023_v31 = vpop.permute.xlu1 %1022 }
  0xff   :  { %vm1079_vm4 = vcmp.eq.s32.totalorder %v2203_v2, %v1023_v31 }
 0x100   :  { %vm1433_vm5 = vmpackc.low %vm1079_vm4, %vm1078_vm2 }
 0x101   :  { %1487 = vmatprep.subr.msk.bf16.mxu1 %vm1433_vm5, %v1594_v8 }
 0x102   :  { %1488 = vmatpush3.bf16.msk.msra.mxu1 %vm1433_vm5, %v1594_v8  ;;  %v939_v43 = vpop.permute.xlu1 %938 }
 0x103   :  { %vm1051_vm7 = vcmp.eq.s32.totalorder %v2203_v2, %v939_v43 }
 0x104   :  { %vm1405_vm8 = vmpackc.low %vm1051_vm7, %vm1050_vm3 }
 0x105   :  { %1454 = vmatpush3.bf16.msk.msra.mxu0 %vm1405_vm8, %v1594_v8 }
 0x107   :  { %v758_v50 = vpop.permute.xlu1 %757 }
 0x108   :  { %1246 = vmatmul.mubr.bf16.vlgmr.msra.gmra.mrb[0].mxu0 %v1207_v49  ;;  %vm761_vm13 = vcmp.eq.s32.totalorder %v758_v50, 1 }
 0x109   :  { %v768_v51 = vsel %vm761_vm13, %v696_v24, %v744_v26  ;;  %v769_v34 = vsel %vm761_vm13, %v697_v21, %v745_v47  ;;  %v770_v10 = vsel %vm761_vm13, %v698_v0, %v746_v11 }
 0x10c   :  { %v1026_v38 = vpop.permute.xlu1 %1025 }
 0x10d   :  { %vm1080_vm6 = vcmp.eq.s32.totalorder %v2203_v2, %v1026_v38 }
 0x10e   :  { %vm1435_vm14 = vmpackc.low %vm1081_vm9, %vm1080_vm6 }
 0x10f   :  { %1489 = vmatprep.subr.msk.bf16.mxu1 %vm1435_vm14, %v1594_v8 }
 0x110   :  { %1490 = vmatpush3.bf16.msk.msra.mxu1 %vm1435_vm14, %v1594_v8 }
 0x111   :  { %v781_v59 = vpop.permute.xlu1 %780 }
 0x112   :  { %v789_v16 = vmul.f32 %v781_v59, %v768_v51  ;;  %v790_v4 = vmul.f32 %v781_v59, %v769_v34  ;;  %v791_v32 = vmul.f32 %v781_v59, %v770_v10 }
 0x114   :  { %v798_v19 = vmul.f32 %v1575_v15, %v789_v16  ;;  %v799_v53 = vmul.f32 %v1577_v54, %v790_v4  ;;  %v800_v13 = vmul.f32 %v1579_v46, %v791_v32 }
 0x116   :  { %v1032_v36 = vpop.permute.xlu1 %1031  ;;  %v837_v28 = vmul.f32 %v2419_v63, %v799_v53  ;;  %v836_v5 = vmul.f32 %v2421_v52, %v798_v19  ;;  %v838_v12 = vmul.f32 %v2425_v14, %v800_v13 }
 0x117   :  { %vm1082_vm10 = vcmp.eq.s32.totalorder %v2203_v2, %v1032_v36 }
 0x118   :  { %vm1437_vm11 = vmpackc.low %vm1083_vm15, %vm1082_vm10  ;;  %v1211_v60 = vpack.c.bf16 %v837_v28, %v837_v28  ;;  %v1210_v55 = vpack.c.bf16 %v836_v5, %v836_v5  ;;  %v1212_v33 = vpack.c.bf16 %v838_v12, %v838_v12 }
 0x119   :  { %1491 = vmatprep.subr.msk.bf16.mxu1 %vm1437_vm11, %v1594_v8 }
 0x11a   :  { %1253 = vmatprep.mubr.bf16.mxu0 %v1211_v60  ;;  %1492 = vmatpush3.bf16.msk.msra.mxu1 %vm1437_vm11, %v1594_v8  ;;  %v1206_v8 = vld [vmem:[%s2502_s3 + $0x10] sm:$0x3] }
 0x11b   :  { %1254 = vmatmul.mubr.bf16.gmra.mrb[4].mxu0 %v1210_v55 }
 0x11d   :  { %1494 = vmatmul.mubr.bf16.vlgmr.msra.gmra.mrb[0].mxu1 %v1212_v33 }
 0x1db   :  { %v1455_v63 = vpop.f32.mrb[0].mxu0 }
 0x1dc   :  { %v1456_v52 = vpop.f32.mrb[1].mxu0 }
 0x1dd   :  { %v1457_v14 = vadd.f32 %v1456_v52, %v1455_v63  ;;  %v1458_v2 = vpop.f32.mrb[2].mxu0 }
 0x1de   :  { %v1459_v9 = vpop.f32.mrb[3].mxu0 }
 0x1df   :  { %v1460_v45 = vadd.f32 %v1459_v9, %v1458_v2 }
 0x1ee   :  { %v1461_v1 = vpop.f32.mrb[4].mxu0 }
 0x1ef   :  { %v1462_v49 = vpop.f32.mrb[5].mxu0 }
 0x1f0   :  { %v1463_v18 = vadd.f32 %v1462_v49, %v1461_v1  ;;  %v1464_v57 = vpop.f32.mrb[6].mxu0  ;;  %v1495_v20 = vpop.f32.mrb[0].mxu1 }
 0x1f1   :  { %v1465_v31 = vpop.f32.mrb[7].mxu0  ;;  %v1295_v22 = vpop.f32.mrb[1].mxu1 }
 0x1f2   :  { %v1304_v37 = vadd.f32 %v1495_v20, %v1463_v18  ;;  %v1296_v29 = vadd.f32 %v1457_v14, %v1295_v22  ;;  %v1496_v42 = vpop.f32.mrb[2].mxu1 }
 0x1f3   :  { %v1298_v3 = vpop.f32.mrb[3].mxu1 }
 0x1f4   :  { %v1311_v58 = vadd.f32 %v1304_v37, %v1206_v8  ;;  %v1299_v30 = vadd.f32 %v1460_v45, %v1298_v3  ;;  %1312 = vst [vmem:[%s2502_s3] sm:$0xff] %v1296_v29 }
 0x1f6   :  { %1314 = vst [vmem:[%s2502_s3 + $0x10] sm:$0x3] %v1311_v58  ;;  %1313 = vst [vmem:[%s2502_s3 + $0x8] sm:$0xff] %v1299_v30 }

</bundles_post_ra>
